<compile_context>
chip_gen: v7x
topology: tpu7x:2x2x1
jax: 0.10.0
libtpu: 0.0.40
codegen_flags: <defaults>
</compile_context>

<pallas_src>
import functools

import jax
import jax.numpy as jnp
from jax.experimental import pallas as pl
from jax.experimental.pallas import tpu as pltpu


def _round_up(x, m):
    return ((x + m - 1) // m) * m


def _ensembler_kernel(x_ref, wexp_ref, b_ref, preds_ref, out_ref, mw_ref,
                      *, batch, tile_b, n_students):
    i = pl.program_id(0)

    # --- Fused AvgPool2d(16) + Linear(12 -> 3): one (tile_b, CHW) x (CHW, 128) matmul ---
    logits = jnp.dot(x_ref[...], wexp_ref[...],
                     preferred_element_type=jnp.float32) + b_ref[...]      # (tile_b, 128)

    # --- ReLU + softmax over the first n_students lanes (f32 math) ---
    lane = jax.lax.broadcasted_iota(jnp.int32, (tile_b, 128), 1)
    valid_lane = lane < n_students
    z = jnp.maximum(logits, 0.0)
    z = jnp.where(valid_lane, z, jnp.float32(-1e30))
    z = z - jnp.max(z, axis=1, keepdims=True)
    e = jnp.exp(z)
    e = jnp.where(valid_lane, e, 0.0)
    w = e * pl.reciprocal(jnp.sum(e, axis=1, keepdims=True), approx=True)  # (tile_b, 128)

    # --- Weighted ensemble of student predictions (lane-dense full-block store) ---
    out = (w[:, 0:1] * preds_ref[0]
           + w[:, 1:2] * preds_ref[1]
           + w[:, 2:3] * preds_ref[2])
    out_ref[...] = out.astype(out_ref.dtype)

    # --- Per-tile partial sums of the softmax weights (padded batch rows masked) ---
    row = jax.lax.broadcasted_iota(jnp.int32, (tile_b, 128), 0) + i * tile_b
    wv = jnp.where(row < batch, w, 0.0)                                    # (tile_b, 128)
    # Fold rows into the native (8, 128) sublane structure; cheap VPU adds, no XLU.
    part = jnp.sum(wv.reshape(tile_b // 8, 8, 128), axis=0)                # (8, 128)
    mw_ref[...] = part.reshape(1, 8, 128)


def one_fc_student_ensembler(inputs, predictions_arr, fc_weight, fc_bias):
    """inputs: (B, 12, 16, 16) NCHW; predictions_arr: list of 3 arrays (B, K);
       fc_weight: (3, 12) (PyTorch Linear layout, out x in); fc_bias: (3,)."""
    assert len(predictions_arr) == 3, "this kernel implements n_students=3"
    B, C, H, W = inputs.shape
    hw = H * W
    chw = C * hw
    p1, p2, p3 = predictions_arr
    K = p1.shape[1]
    n_students = 3

    # Batch tiling: tile_b multiple of 8, sized so double-buffered tiles fit the
    # default scoped VMEM on every chip (v5e 16 MiB ... v7x 32 MiB).
    tile_b = min(256, _round_up(B, 8))
    b_pad = _round_up(B, tile_b)
    num_tiles = b_pad // tile_b
    k_pad = _round_up(K, 128)

    # Lane-dense input slab (no forced dtype cast).
    x = inputs.reshape(B, chw)
    if b_pad != B:
        x = jnp.pad(x, ((0, b_pad - B), (0, 0)))

    # Expanded FC weight folding the average pooling:
    #   Wexp[c*hw + j, s] = fc_w[s, c] / hw   for s < 3, zeros for s >= 3.
    wexp = jnp.repeat(fc_weight.T.astype(jnp.float32) / float(hw), hw, axis=0)  # (chw, 3)
    wexp = jnp.pad(wexp, ((0, 0), (0, 128 - n_students))).astype(x.dtype)       # (chw, 128)
    bias = jnp.pad(fc_bias.astype(jnp.float32).reshape(1, n_students),
                   ((0, 0), (0, 128 - n_students)))                             # (1, 128)

    # Single lane-padded prediction slab: (3, B_pad, k_pad).
    preds = jnp.stack([p1, p2, p3], axis=0)
    preds = jnp.pad(preds, ((0, 0), (0, b_pad - B), (0, k_pad - K)))

    out_shape = (
        jax.ShapeDtypeStruct((b_pad, k_pad), p1.dtype),          # padded group_out
        jax.ShapeDtypeStruct((num_tiles, 8, 128), jnp.float32),  # per-tile weight sums
    )

    kernel = functools.partial(_ensembler_kernel, batch=B, tile_b=tile_b,
                               n_students=n_students)

    group_out_pad, mw_tiles = pl.pallas_call(
        kernel,
        out_shape=out_shape,
        grid=(num_tiles,),
        in_specs=[
            pl.BlockSpec((tile_b, chw), lambda i: (i, 0)),
            pl.BlockSpec((chw, 128), lambda i: (0, 0)),
            pl.BlockSpec((1, 128), lambda i: (0, 0)),
            pl.BlockSpec((3, tile_b, k_pad), lambda i: (0, i, 0)),
        ],
        out_specs=[
            pl.BlockSpec((tile_b, k_pad), lambda i: (i, 0)),
            pl.BlockSpec((1, 8, 128), lambda i: (i, 0, 0)),
        ],
        compiler_params=pltpu.CompilerParams(
            dimension_semantics=("parallel",),
            vmem_limit_bytes=32 * 1024 * 1024),
    )(x, wexp, bias, preds)

    group_out = group_out_pad[:B, :K]
    means = jnp.sum(mw_tiles, axis=(0, 1))[:n_students] / B     # (3,)
    # Mirror the PyTorch return: (group_out, [mean_w1, mean_w2, mean_w3])
    return group_out, [means[0], means[1], means[2]]


def _reference(inputs, preds, fc_w, fc_b):
    """Pure-JAX reference of the PyTorch forward for verification."""
    B = inputs.shape[0]
    pooled = jnp.mean(inputs, axis=(2, 3)).reshape(B, -1)          # (B, 12)
    logits = pooled @ fc_w.T + fc_b                                # (B, 3)
    w = jax.nn.softmax(jax.nn.relu(logits), axis=1)                # (B, 3)
    go = (w[:, 0:1] * preds[0] + w[:, 1:2] * preds[1]
          + w[:, 2:3] * preds[2])
    return go, [jnp.mean(w[:, 0]), jnp.mean(w[:, 1]), jnp.mean(w[:, 2])]


if __name__ == "__main__":
    key = jax.random.PRNGKey(0)
    k_x, k_w, k_b, k_p1, k_p2, k_p3 = jax.random.split(key, 6)

    B, C, H, W = 2, 12, 16, 16   # C*(H/16)*(W/16) = 12 = FC in_features
    K = 10                       # number of classes in student predictions

    inputs = jax.random.normal(k_x, (B, C, H, W), dtype=jnp.float32)
    preds = [
        jax.random.normal(k_p1, (B, K), dtype=jnp.float32),
        jax.random.normal(k_p2, (B, K), dtype=jnp.float32),
        jax.random.normal(k_p3, (B, K), dtype=jnp.float32),
    ]

    # Deterministic Linear(12, 3) init (PyTorch-style uniform bound = 1/sqrt(fan_in)).
    bound = 1.0 / jnp.sqrt(12.0)
    fc_weight = jax.random.uniform(k_w, (3, 12), jnp.float32, -bound, bound)
    fc_bias = jax.random.uniform(k_b, (3,), jnp.float32, -bound, bound)

    group_out, st_w = one_fc_student_ensembler(inputs, preds, fc_weight, fc_bias)
    group_out = jax.block_until_ready(group_out)
    st_w = [jax.block_until_ready(w) for w in st_w]

    ref_out, ref_w = _reference(inputs, preds, fc_weight, fc_bias)
    # Tolerance accounts for the fused 3072-deep MXU contraction and the EUP
    # approximate reciprocal in the softmax (both well below 2e-3 on O(1) outputs).
    assert jnp.allclose(group_out, ref_out, atol=2e-3, rtol=2e-3)
    for a, b in zip(st_w, ref_w):
        assert jnp.allclose(a, b, atol=2e-3, rtol=2e-3)

    print("KERNEL_OK")
</pallas_src>

<mosaic_0001>
module attributes {stable_mosaic.version = 11 : i64} {
  func.func @_ensembler_kernel(%arg0: i32, %arg1: memref<8x3072xf32, #tpu.memory_space<vmem>>, %arg2: memref<3072x128xf32, #tpu.memory_space<vmem>>, %arg3: memref<1x128xf32, #tpu.memory_space<vmem>>, %arg4: memref<3x8x128xf32, #tpu.memory_space<vmem>>, %arg5: memref<8x128xf32, #tpu.memory_space<vmem>>, %arg6: memref<1x8x128xf32, #tpu.memory_space<vmem>>) attributes {dimension_semantics = [#tpu.dimension_semantics<parallel>], iteration_bounds = array<i64: 1>, scalar_prefetch = 0 : i64, scratch_operands = 0 : i64, tpu.core_type = #tpu.core_type<tc>, window_params = [{transform_indices = @transform_0, window_bounds = array<i64: 8, 3072>}, {pipeline_mode = #tpu.pipeline_mode<synchronous>, transform_indices = @transform_1, window_bounds = array<i64: 3072, 128>}, {pipeline_mode = #tpu.pipeline_mode<synchronous>, transform_indices = @transform_2, window_bounds = array<i64: 1, 128>}, {transform_indices = @transform_3, window_bounds = array<i64: 3, 8, 128>}, {transform_indices = @transform_4, window_bounds = array<i64: 8, 128>}, {transform_indices = @transform_5, window_bounds = array<i64: 1, 8, 128>}]} {
    %c0 = arith.constant 0 : index
    %c0_0 = arith.constant 0 : index
    %0 = vector.load %arg1[%c0, %c0_0] : memref<8x3072xf32, #tpu.memory_space<vmem>>, vector<8x3072xf32>
    %c0_1 = arith.constant 0 : index
    %c0_2 = arith.constant 0 : index
    %1 = vector.load %arg2[%c0_1, %c0_2] : memref<3072x128xf32, #tpu.memory_space<vmem>>, vector<3072x128xf32>
    %cst = arith.constant dense<0.000000e+00> : vector<8x128xf32>
    %2 = tpu.matmul %0, %1, %cst {dimension_numbers = #tpu.dot_dimension_numbers<[1], [0], [0], [1], [0, 0, 1, 1], [], []>} : vector<8x3072xf32>, vector<3072x128xf32>, vector<8x128xf32> -> vector<8x128xf32>
    %c0_3 = arith.constant 0 : index
    %c0_4 = arith.constant 0 : index
    %3 = vector.load %arg3[%c0_3, %c0_4] : memref<1x128xf32, #tpu.memory_space<vmem>>, vector<1x128xf32>
    %4 = vector.broadcast %3 : vector<1x128xf32> to vector<8x128xf32>
    %5 = arith.addf %2, %4 : vector<8x128xf32>
    %6 = tpu.iota {dimensions = array<i32: 1>} : vector<8x128xi32>
    %c3_i32 = arith.constant 3 : i32
    %7 = vector.broadcast %c3_i32 : i32 to vector<8x128xi32>
    %8 = arith.cmpi slt, %6, %7 : vector<8x128xi32>
    %cst_5 = arith.constant 0.000000e+00 : f32
    %9 = vector.broadcast %cst_5 : f32 to vector<8x128xf32>
    %10 = arith.maximumf %5, %9 : vector<8x128xf32>
    %cst_6 = arith.constant -1.000000e+30 : f32
    %11 = vector.broadcast %cst_6 : f32 to vector<8x128xf32>
    %12 = arith.select %8, %10, %11 : vector<8x128xi1>, vector<8x128xf32>
    %cst_7 = arith.constant dense<0xFF800000> : vector<8xf32>
    %13 = vector.multi_reduction <maximumf>, %12, %cst_7 [1] : vector<8x128xf32> to vector<8xf32>
    %14 = vector.shape_cast %13 : vector<8xf32> to vector<8x1xf32>
    %15 = vector.broadcast %14 : vector<8x1xf32> to vector<8x128xf32>
    %16 = arith.subf %12, %15 : vector<8x128xf32>
    %17 = math.exp %16 : vector<8x128xf32>
    %cst_8 = arith.constant 0.000000e+00 : f32
    %18 = vector.broadcast %cst_8 : f32 to vector<8x128xf32>
    %19 = arith.select %8, %17, %18 : vector<8x128xi1>, vector<8x128xf32>
    %cst_9 = arith.constant dense<0.000000e+00> : vector<8xf32>
    %20 = vector.multi_reduction <add>, %19, %cst_9 [1] : vector<8x128xf32> to vector<8xf32>
    %21 = vector.shape_cast %20 : vector<8xf32> to vector<8x1xf32>
    %22 = tpu.reciprocal %21 {approx = true} : vector<8x1xf32> -> vector<8x1xf32>
    %23 = vector.broadcast %22 : vector<8x1xf32> to vector<8x128xf32>
    %24 = arith.mulf %19, %23 : vector<8x128xf32>
    %25 = vector.extract_strided_slice %24 {offsets = [0, 0], sizes = [8, 1], strides = [1, 1]} : vector<8x128xf32> to vector<8x1xf32>
    %c0_10 = arith.constant 0 : index
    %c0_11 = arith.constant 0 : index
    %c0_12 = arith.constant 0 : index
    %26 = vector.load %arg4[%c0_10, %c0_11, %c0_12] : memref<3x8x128xf32, #tpu.memory_space<vmem>>, vector<1x8x128xf32>
    %27 = vector.shape_cast %26 : vector<1x8x128xf32> to vector<8x128xf32>
    %28 = vector.broadcast %25 : vector<8x1xf32> to vector<8x128xf32>
    %29 = arith.mulf %28, %27 : vector<8x128xf32>
    %30 = vector.extract_strided_slice %24 {offsets = [0, 1], sizes = [8, 1], strides = [1, 1]} : vector<8x128xf32> to vector<8x1xf32>
    %c1 = arith.constant 1 : index
    %c0_13 = arith.constant 0 : index
    %c0_14 = arith.constant 0 : index
    %31 = vector.load %arg4[%c1, %c0_13, %c0_14] : memref<3x8x128xf32, #tpu.memory_space<vmem>>, vector<1x8x128xf32>
    %32 = vector.shape_cast %31 : vector<1x8x128xf32> to vector<8x128xf32>
    %33 = vector.broadcast %30 : vector<8x1xf32> to vector<8x128xf32>
    %34 = arith.mulf %33, %32 : vector<8x128xf32>
    %35 = arith.addf %29, %34 : vector<8x128xf32>
    %36 = vector.extract_strided_slice %24 {offsets = [0, 2], sizes = [8, 1], strides = [1, 1]} : vector<8x128xf32> to vector<8x1xf32>
    %c2 = arith.constant 2 : index
    %c0_15 = arith.constant 0 : index
    %c0_16 = arith.constant 0 : index
    %37 = vector.load %arg4[%c2, %c0_15, %c0_16] : memref<3x8x128xf32, #tpu.memory_space<vmem>>, vector<1x8x128xf32>
    %38 = vector.shape_cast %37 : vector<1x8x128xf32> to vector<8x128xf32>
    %39 = vector.broadcast %36 : vector<8x1xf32> to vector<8x128xf32>
    %40 = arith.mulf %39, %38 : vector<8x128xf32>
    %41 = arith.addf %35, %40 : vector<8x128xf32>
    %c0_17 = arith.constant 0 : index
    %c0_18 = arith.constant 0 : index
    %42 = vector.load %arg5[%c0_17, %c0_18] : memref<8x128xf32, #tpu.memory_space<vmem>>, vector<8x128xf32>
    tpu.vector_store %arg5[%c0_17, %c0_18], %41 {strides = array<i32>} : memref<8x128xf32, #tpu.memory_space<vmem>>, vector<8x128xf32>,
    %43 = tpu.iota {dimensions = array<i32: 0>} : vector<8x128xi32>
    %c8_i32 = arith.constant 8 : i32
    %44 = arith.muli %arg0, %c8_i32 : i32
    %45 = vector.broadcast %44 : i32 to vector<8x128xi32>
    %46 = arith.addi %43, %45 : vector<8x128xi32>
    %c2_i32 = arith.constant 2 : i32
    %47 = vector.broadcast %c2_i32 : i32 to vector<8x128xi32>
    %48 = arith.cmpi slt, %46, %47 : vector<8x128xi32>
    %cst_19 = arith.constant 0.000000e+00 : f32
    %49 = vector.broadcast %cst_19 : f32 to vector<8x128xf32>
    %50 = arith.select %48, %24, %49 : vector<8x128xi1>, vector<8x128xf32>
    %51 = vector.shape_cast %50 : vector<8x128xf32> to vector<1x8x128xf32>
    %cst_20 = arith.constant dense<0.000000e+00> : vector<8x128xf32>
    %52 = vector.multi_reduction <add>, %51, %cst_20 [0] : vector<1x8x128xf32> to vector<8x128xf32>
    %53 = vector.shape_cast %52 : vector<8x128xf32> to vector<1x8x128xf32>
    %c0_21 = arith.constant 0 : index
    %c0_22 = arith.constant 0 : index
    %c0_23 = arith.constant 0 : index
    %54 = vector.load %arg6[%c0_21, %c0_22, %c0_23] : memref<1x8x128xf32, #tpu.memory_space<vmem>>, vector<1x8x128xf32>
    tpu.vector_store %arg6[%c0_21, %c0_22, %c0_23], %53 {strides = array<i32>} : memref<1x8x128xf32, #tpu.memory_space<vmem>>, vector<1x8x128xf32>,
    return
  }
  func.func @transform_0(%arg0: i32) -> (i32, i32) {
    %c0_i32 = arith.constant 0 : i32
    %c0_i32_0 = arith.constant 0 : i32
    return %arg0, %c0_i32 : i32, i32
  }
  func.func @transform_1(%arg0: i32) -> (i32, i32) {
    %c0_i32 = arith.constant 0 : i32
    %c0_i32_0 = arith.constant 0 : i32
    %c0_i32_1 = arith.constant 0 : i32
    return %c0_i32, %c0_i32_0 : i32, i32
  }
  func.func @transform_2(%arg0: i32) -> (i32, i32) {
    %c0_i32 = arith.constant 0 : i32
    %c0_i32_0 = arith.constant 0 : i32
    %c0_i32_1 = arith.constant 0 : i32
    return %c0_i32, %c0_i32_0 : i32, i32
  }
  func.func @transform_3(%arg0: i32) -> (i32, i32, i32) {
    %c0_i32 = arith.constant 0 : i32
    %c0_i32_0 = arith.constant 0 : i32
    %c0_i32_1 = arith.constant 0 : i32
    return %c0_i32, %arg0, %c0_i32_0 : i32, i32, i32
  }
  func.func @transform_4(%arg0: i32) -> (i32, i32) {
    %c0_i32 = arith.constant 0 : i32
    %c0_i32_0 = arith.constant 0 : i32
    return %arg0, %c0_i32 : i32, i32
  }
  func.func @transform_5(%arg0: i32) -> (i32, i32, i32) {
    %c0_i32 = arith.constant 0 : i32
    %c0_i32_0 = arith.constant 0 : i32
    %c0_i32_1 = arith.constant 0 : i32
    return %arg0, %c0_i32, %c0_i32_0 : i32, i32, i32
  }
}

</mosaic_0001>

<bundles_post_ra>
// kernel: tpu_custom_call.1
= control target key start
LH: loop header
LB: loop body
LE: loop exit
PB: predicated region body
PF: predicated region fallthrough
CT: control target
= control target key end

     0   :  { %11 = vsyncpa [#allocation3], 0  ;;  %s2490_s0 = inlined_call_operand.hbm [shape: f32[8,3072], index: 0, kind: input, shape index: {}]   ;;  %s2491_s1 = inlined_call_operand.hbm [shape: f32[3072,128], index: 1, kind: input, shape index: {}]   ;;  %s2492_s2 = inlined_call_operand.hbm [shape: f32[1,128], index: 2, kind: input, shape index: {}]   ;;  %s2493_s3 = inlined_call_operand.hbm [shape: f32[3,8,128], index: 3, kind: input, shape index: {}]   ;;  %s2494_s4 = inlined_call_operand.hbm [shape: f32[8,128], index: 4, kind: output, shape index: {0}]   ;;  %s2495_s5 = inlined_call_operand.hbm [shape: f32[1,8,128], index: 5, kind: output, shape index: {1}]  }
   0x1   :  { %12 = vsyncpa [#allocation6], 0 }
   0x2   :  { %13 = vsyncpa [#allocation9], 0 }
   0x3   :  { %14 = vsyncpa [#allocation4], 0 }
   0x4   :  { %15 = vsyncpa [#allocation12], 0  ;;  %s2371_s18 = smov [#allocation5]   ;;  %s2229_s22 = scalar_lea.hbm %s2491_s1, 49152 }
   0x5   :  { %s31_s19 = sshll.u32 %s2371_s18, 4  ;;  %p2230_p0 = scmp.ne.s32.totalorder %s2491_s1, %s2229_s22  ;;  %s32_s19 = int_to_ptr.vmem [resolvable:$true] %s31_s19 }
   0x6   :  { %p2233_p1 = scmp.lt.u32.totalorder %s2229_s22, %s2491_s1 }
   0x8   :  { %p2235_p2 = pnand %p2233_p1, %p2230_p0 }
   0xa   :  { %2238 = shalt.err (!%p2235_p2)
}
   0xb   :  { %s2239_s27 = scalar_lea.vmem %s32_s19, 49152  ;;  %p2244_p4 = scmp.lt.s32.totalorder %s32_s19, %s32_s19 }
   0xc   :  { %p2240_p3 = scmp.ne.s32.totalorder %s32_s19, %s2239_s27  ;;  %p2245_p5 = scmp.lt.s32.totalorder %s2239_s27, %s2239_s27 }
   0xe   :  { %p2246_p6 = por %p2245_p5, %p2244_p4 }
  0x10   :  { %p2247_p7 = pnand %p2246_p6, %p2240_p3 }
  0x12   :  { %2250 = shalt.err (!%p2247_p7)
}
  0x13   :  { %s2372_s28 = smov 128   ;;  %s2373_s29 = smov 8  }
  0x14   :  { %37 = dma.hbm_to_vmem [thread:$0]  %s2491_s1, 49152, %s32_s19, [#allocation6], %s2372_s28, %s2372_s28, %s2373_s29  }
  0x15   :  { %s2374_s7 = smov [#allocation2]   ;;  %s2375_s9 = smov [#allocation7]  }
  0x16   :  { %s22_s8 = sshll.u32 %s2374_s7, 4  ;;  %s44_s10 = sshll.u32 %s2375_s9, 4  ;;  %s23_s8 = int_to_ptr.vmem [resolvable:$true] %s22_s8  ;;  %s45_s10 = int_to_ptr.vmem [resolvable:$true] %s44_s10 }
  0x17   :  { %s2251_s13 = scalar_lea.hbm %s2490_s0, 3072 }
  0x18   :  { %p2252_p8 = scmp.ne.s32.totalorder %s2490_s0, %s2251_s13  ;;  %p2255_p9 = scmp.lt.u32.totalorder %s2251_s13, %s2490_s0 }
  0x1a   :  { %p2257_p10 = pnand %p2255_p9, %p2252_p8 }
  0x1c   :  { %2260 = shalt.err (!%p2257_p10)
}
  0x1d   :  { %s2261_s1 = scalar_lea.vmem %s23_s8, 3072  ;;  %p2266_p12 = scmp.lt.s32.totalorder %s23_s8, %s23_s8 }
  0x1e   :  { %p2262_p11 = scmp.ne.s32.totalorder %s23_s8, %s2261_s1  ;;  %p2267_p13 = scmp.lt.s32.totalorder %s2261_s1, %s2261_s1 }
  0x20   :  { %p2268_p0 = por %p2267_p13, %p2266_p12 }
  0x22   :  { %p2269_p1 = pnand %p2268_p0, %p2262_p11 }
  0x24   :  { %2272 = shalt.err (!%p2269_p1)
}
  0x25   :  { %25 = dma.hbm_to_vmem [thread:$0]  %s2490_s0, 3072, %s23_s8, [#allocation3]  }
  0x26   :  { %s2273_s22 = scalar_lea.hbm %s2492_s2, 16 }
  0x27   :  { %p2274_p2 = scmp.ne.s32.totalorder %s2492_s2, %s2273_s22  ;;  %p2277_p3 = scmp.lt.u32.totalorder %s2273_s22, %s2492_s2 }
  0x29   :  { %p2279_p4 = pnand %p2277_p3, %p2274_p2 }
  0x2b   :  { %2282 = shalt.err (!%p2279_p4)
}
  0x2c   :  { %s2283_s27 = scalar_lea.vmem %s45_s10, 16  ;;  %s2287_s30 = scalar_lea.vmem %s45_s10, 32 }
  0x2d   :  { %p2284_p5 = scmp.ne.s32.totalorder %s45_s10, %s2283_s27  ;;  %p2288_p6 = scmp.lt.s32.totalorder %s45_s10, %s45_s10 }
  0x2e   :  { %p2289_p7 = scmp.lt.s32.totalorder %s2287_s30, %s2283_s27 }
  0x30   :  { %p2290_p8 = por %p2289_p7, %p2288_p6 }
  0x32   :  { %p2291_p9 = pnand %p2290_p8, %p2284_p5 }
  0x34   :  { %2294 = shalt.err (!%p2291_p9)
}
  0x35   :  { %47 = dma.hbm_to_vmem [thread:$0]  %s2492_s2, 16, %s45_s10, [#allocation6]  }
  0x36   :  { %s2376_s7 = smov [#allocation8]   ;;  %s2295_s12 = scalar_lea.hbm %s2493_s3, 384 }
  0x37   :  { %s53_s8 = sshll.u32 %s2376_s7, 4  ;;  %p2296_p10 = scmp.ne.s32.totalorder %s2493_s3, %s2295_s12  ;;  %s54_s8 = int_to_ptr.vmem [resolvable:$true] %s53_s8 }
  0x38   :  { %p2299_p11 = scmp.lt.u32.totalorder %s2295_s12, %s2493_s3 }
  0x3a   :  { %p2301_p12 = pnand %p2299_p11, %p2296_p10 }
  0x3c   :  { %2304 = shalt.err (!%p2301_p12)
}
  0x3d   :  { %s2305_s17 = scalar_lea.vmem %s54_s8, 384  ;;  %p2310_p0 = scmp.lt.s32.totalorder %s54_s8, %s54_s8 }
  0x3e   :  { %p2306_p13 = scmp.ne.s32.totalorder %s54_s8, %s2305_s17  ;;  %p2311_p1 = scmp.lt.s32.totalorder %s2305_s17, %s2305_s17 }
  0x40   :  { %p2312_p2 = por %p2311_p1, %p2310_p0 }
  0x42   :  { %p2313_p3 = pnand %p2312_p2, %p2306_p13 }
  0x44   :  { %2316 = shalt.err (!%p2313_p3)
}
  0x45   :  { %59 = dma.hbm_to_vmem [thread:$0]  %s2493_s3, 384, %s54_s8, [#allocation9], %s2372_s28, %s2372_s28, %s2373_s29  }
  0x46   :  { %2361 = dma.done.wait [#allocation3], 3072  }
  0x47   :  { %2362 = vsyncadd [#allocation3], 4294964224 }
  0x48   :  { %2363 = dma.done.wait [#allocation6], 49168  }
  0x49   :  { %2364 = vsyncadd [#allocation6], 4294918128 }
  0x4a   :  { %2365 = dma.done.wait [#allocation9], 384  }
  0x4b   :  { %2366 = vsyncadd [#allocation9], 4294966912  ;;  %v112_v0 = vld [vmem:[#allocation5 + $0x80] sm:$0xff]  ;;  %v113_v1 = vld [vmem:[#allocation5 + $0x88] sm:$0xff]  ;;  %s2380_s3 = smov [#allocation11]  }
  0x4c   :  { %v96_v2 = vld [vmem:[#allocation5] sm:$0xff]  ;;  %v1827_v3 = vpack.c.bf16 %v113_v1, %v112_v0  ;;  %v97_v4 = vld [vmem:[#allocation5 + $0x8] sm:$0xff]  ;;  %v114_v11 = vld [vmem:[#allocation5 + $0x90] sm:$0xff]  ;;  %s1391_s28 = sshll.u32 %s2380_s3, 4  ;;  %s1392_s28 = int_to_ptr.vmem [resolvable:$true] %s1391_s28 }
  0x4d   :  { %v144_v5 = vld [vmem:[#allocation5 + $0x180] sm:$0xff]  ;;  %v145_v6 = vld [vmem:[#allocation5 + $0x188] sm:$0xff]  ;;  %v1829_v7 = vpack.c.bf16 %v97_v4, %v96_v2  ;;  %v115_v13 = vld [vmem:[#allocation5 + $0x98] sm:$0xff]  ;;  %s2317_s29 = scalar_lea.vmem %s1392_s28, 128  ;;  %p2322_p5 = scmp.lt.s32.totalorder %s1392_s28, %s1392_s28 }
  0x4e   :  { %v1859_v8 = vpack.c.bf16 %v145_v6, %v144_v5  ;;  %v128_v9 = vld [vmem:[#allocation5 + $0x100] sm:$0xff]  ;;  %v129_v10 = vld [vmem:[#allocation5 + $0x108] sm:$0xff]  ;;  %1828 = vmatprep.subr.bf16.mxu0 %v1827_v3  ;;  %v98_v14 = vld [vmem:[#allocation5 + $0x10] sm:$0xff]  ;;  %v1831_v16 = vpack.c.bf16 %v115_v13, %v114_v11  ;;  %p2318_p4 = scmp.ne.s32.totalorder %s1392_s28, %s2317_s29  ;;  %p2323_p6 = scmp.lt.s32.totalorder %s2317_s29, %s2317_s29 }
  0x4f   :  { %v1861_v12 = vpack.c.bf16 %v129_v10, %v128_v9  ;;  %v99_v15 = vld [vmem:[#allocation5 + $0x18] sm:$0xff]  ;;  %1830 = vmatpush3.bf16.msra.mxu0 %v1829_v7  ;;  %v146_v18 = vld [vmem:[#allocation5 + $0x190] sm:$0xff]  ;;  %v116_v23 = vld [vmem:[#allocation5 + $0xa0] sm:$0xff] }
  0x50   :  { %1860 = vmatprep.subr.bf16.mxu1 %v1859_v8  ;;  %v1833_v17 = vpack.c.bf16 %v99_v15, %v98_v14  ;;  %v147_v19 = vld [vmem:[#allocation5 + $0x198] sm:$0xff]  ;;  %v130_v20 = vld [vmem:[#allocation5 + $0x110] sm:$0xff]  ;;  %v117_v24 = vld [vmem:[#allocation5 + $0xa8] sm:$0xff]  ;;  %1832 = vmatprep.subr.bf16.mxu0 %v1831_v16  ;;  %p2324_p7 = por %p2323_p6, %p2322_p5 }
  0x51   :  { %1862 = vmatpush3.bf16.msra.mxu1 %v1861_v12  ;;  %v1863_v21 = vpack.c.bf16 %v147_v19, %v146_v18  ;;  %v131_v22 = vld [vmem:[#allocation5 + $0x118] sm:$0xff]  ;;  %v1835_v26 = vpack.c.bf16 %v117_v24, %v116_v23  ;;  %v100_v27 = vld [vmem:[#allocation5 + $0x20] sm:$0xff]  ;;  %v101_v28 = vld [vmem:[#allocation5 + $0x28] sm:$0xff] }
  0x52   :  { %v1865_v25 = vpack.c.bf16 %v131_v22, %v130_v20  ;;  %v148_v29 = vld [vmem:[#allocation5 + $0x1a0] sm:$0xff]  ;;  %v149_v30 = vld [vmem:[#allocation5 + $0x1a8] sm:$0xff]  ;;  %v1837_v33 = vpack.c.bf16 %v101_v28, %v100_v27  ;;  %v118_v35 = vld [vmem:[#allocation5 + $0xb0] sm:$0xff]  ;;  %p2325_p8 = pnand %p2324_p7, %p2318_p4 }
  0x53   :  { %1864 = vmatprep.subr.bf16.mxu1 %v1863_v21  ;;  %v132_v31 = vld [vmem:[#allocation5 + $0x120] sm:$0xff]  ;;  %v133_v32 = vld [vmem:[#allocation5 + $0x128] sm:$0xff]  ;;  %1834 = vmatpush3.bf16.msra.mxu0 %v1833_v17  ;;  %v1867_v34 = vpack.c.bf16 %v149_v30, %v148_v29  ;;  %v119_v36 = vld [vmem:[#allocation5 + $0xb8] sm:$0xff] }
  0x54   :  { %v102_v37 = vld [vmem:[#allocation5 + $0x30] sm:$0xff]  ;;  %1836 = vmatprep.subr.bf16.mxu0 %v1835_v26  ;;  %v1869_v38 = vpack.c.bf16 %v133_v32, %v132_v31  ;;  %v1839_v39 = vpack.c.bf16 %v119_v36, %v118_v35  ;;  %v103_v40 = vld [vmem:[#allocation5 + $0x38] sm:$0xff]  ;;  %v120_v46 = vld [vmem:[#allocation5 + $0xc0] sm:$0xff] }
  0x55   :  { %1866 = vmatpush3.bf16.msra.mxu1 %v1865_v25  ;;  %v150_v41 = vld [vmem:[#allocation5 + $0x1b0] sm:$0xff]  ;;  %v151_v42 = vld [vmem:[#allocation5 + $0x1b8] sm:$0xff]  ;;  %v121_v47 = vld [vmem:[#allocation5 + $0xc8] sm:$0xff]  ;;  %v1841_v48 = vpack.c.bf16 %v103_v40, %v102_v37 }
  0x56   :  { %1868 = vmatprep.subr.bf16.mxu1 %v1867_v34  ;;  %v1871_v43 = vpack.c.bf16 %v151_v42, %v150_v41  ;;  %v134_v44 = vld [vmem:[#allocation5 + $0x130] sm:$0xff]  ;;  %v135_v45 = vld [vmem:[#allocation5 + $0x138] sm:$0xff]  ;;  %v152_v49 = vld [vmem:[#allocation5 + $0x1c0] sm:$0xff]  ;;  %v1843_v52 = vpack.c.bf16 %v121_v47, %v120_v46 }
  0x57   :  { %1838 = vmatpush3.bf16.msra.mxu0 %v1837_v33  ;;  %v153_v50 = vld [vmem:[#allocation5 + $0x1c8] sm:$0xff]  ;;  %v1873_v51 = vpack.c.bf16 %v135_v45, %v134_v44  ;;  %v104_v53 = vld [vmem:[#allocation5 + $0x40] sm:$0xff]  ;;  %v122_v58 = vld [vmem:[#allocation5 + $0xd0] sm:$0xff] }
  0x58   :  { %1840 = vmatprep.subr.bf16.mxu0 %v1839_v39  ;;  %v105_v54 = vld [vmem:[#allocation5 + $0x48] sm:$0xff]  ;;  %v136_v55 = vld [vmem:[#allocation5 + $0x140] sm:$0xff]  ;;  %v1875_v56 = vpack.c.bf16 %v153_v50, %v152_v49  ;;  %v123_v59 = vld [vmem:[#allocation5 + $0xd8] sm:$0xff] }
  0x59   :  { %1870 = vmatpush3.bf16.msra.mxu1 %v1869_v38  ;;  %v137_v57 = vld [vmem:[#allocation5 + $0x148] sm:$0xff]  ;;  %v154_v60 = vld [vmem:[#allocation5 + $0x1d0] sm:$0xff]  ;;  %v155_v61 = vld [vmem:[#allocation5 + $0x1d8] sm:$0xff]  ;;  %v1845_v62 = vpack.c.bf16 %v105_v54, %v104_v53  ;;  %v1847_v0 = vpack.c.bf16 %v123_v59, %v122_v58 }
  0x5a   :  { %1872 = vmatprep.subr.bf16.mxu1 %v1871_v43  ;;  %v1877_v63 = vpack.c.bf16 %v137_v57, %v136_v55  ;;  %v106_v1 = vld [vmem:[#allocation5 + $0x50] sm:$0xff]  ;;  %v107_v2 = vld [vmem:[#allocation5 + $0x58] sm:$0xff]  ;;  %v1879_v4 = vpack.c.bf16 %v155_v61, %v154_v60  ;;  %v124_v6 = vld [vmem:[#allocation5 + $0xe0] sm:$0xff] }
  0x5b   :  { %1842 = vmatpush3.bf16.msra.mxu0 %v1841_v48  ;;  %v138_v3 = vld [vmem:[#allocation5 + $0x150] sm:$0xff]  ;;  %v139_v5 = vld [vmem:[#allocation5 + $0x158] sm:$0xff]  ;;  %v125_v7 = vld [vmem:[#allocation5 + $0xe8] sm:$0xff]  ;;  %v1849_v10 = vpack.c.bf16 %v107_v2, %v106_v1 }
  0x5c   :  { %1844 = vmatprep.subr.bf16.mxu0 %v1843_v52  ;;  %v156_v8 = vld [vmem:[#allocation5 + $0x1e0] sm:$0xff]  ;;  %v157_v9 = vld [vmem:[#allocation5 + $0x1e8] sm:$0xff]  ;;  %v1881_v13 = vpack.c.bf16 %v139_v5, %v138_v3  ;;  %v1851_v14 = vpack.c.bf16 %v125_v7, %v124_v6  ;;  %v126_v19 = vld [vmem:[#allocation5 + $0xf0] sm:$0xff] }
  0x5d   :  { %1874 = vmatpush3.bf16.msra.mxu1 %v1873_v51  ;;  %v108_v11 = vld [vmem:[#allocation5 + $0x60] sm:$0xff]  ;;  %v109_v12 = vld [vmem:[#allocation5 + $0x68] sm:$0xff]  ;;  %v1883_v18 = vpack.c.bf16 %v157_v9, %v156_v8  ;;  %v127_v20 = vld [vmem:[#allocation5 + $0xf8] sm:$0xff] }
  0x5e   :  { %1876 = vmatprep.subr.bf16.mxu1 %v1875_v56  ;;  %v140_v15 = vld [vmem:[#allocation5 + $0x160] sm:$0xff]  ;;  %v141_v16 = vld [vmem:[#allocation5 + $0x168] sm:$0xff]  ;;  %v75_v21 = vld [vmem:[#allocation2 + $0x18] sm:$0xff]  ;;  %v1853_v24 = vpack.c.bf16 %v109_v12, %v108_v11  ;;  %v1855_v26 = vpack.c.bf16 %v127_v20, %v126_v19 }
  0x5f   :  { %1846 = vmatpush3.bf16.msra.mxu0 %v1845_v62  ;;  %v73_v17 = vld [vmem:[#allocation2 + $0x8] sm:$0xff]  ;;  %v158_v22 = vld [vmem:[#allocation5 + $0x1f0] sm:$0xff]  ;;  %v159_v23 = vld [vmem:[#allocation5 + $0x1f8] sm:$0xff]  ;;  %621 = vmatprep.mubr.f32.mxu1 %v75_v21  ;;  %v1885_v25 = vpack.c.bf16 %v141_v16, %v140_v15 }
  0x60   :  { %1848 = vmatprep.subr.bf16.mxu0 %v1847_v0  ;;  %551 = vmatprep.mubr.f32.mxu0 %v73_v17  ;;  %v110_v27 = vld [vmem:[#allocation5 + $0x70] sm:$0xff]  ;;  %v111_v28 = vld [vmem:[#allocation5 + $0x78] sm:$0xff]  ;;  %v1887_v30 = vpack.c.bf16 %v159_v23, %v158_v22  ;;  %v176_v32 = vld [vmem:[#allocation5 + $0x280] sm:$0xff] }
  0x61   :  { %1878 = vmatpush3.bf16.msra.mxu1 %v1877_v63  ;;  %v142_v29 = vld [vmem:[#allocation5 + $0x170] sm:$0xff]  ;;  %v143_v31 = vld [vmem:[#allocation5 + $0x178] sm:$0xff]  ;;  %v177_v33 = vld [vmem:[#allocation5 + $0x288] sm:$0xff]  ;;  %v1857_v36 = vpack.c.bf16 %v111_v28, %v110_v27 }
  0x62   :  { %1880 = vmatprep.subr.bf16.mxu1 %v1879_v4  ;;  %v208_v34 = vld [vmem:[#allocation5 + $0x380] sm:$0xff]  ;;  %v209_v35 = vld [vmem:[#allocation5 + $0x388] sm:$0xff]  ;;  %v1889_v37 = vpack.c.bf16 %v143_v31, %v142_v29  ;;  %v1891_v38 = vpack.c.bf16 %v177_v33, %v176_v32  ;;  %v178_v44 = vld [vmem:[#allocation5 + $0x290] sm:$0xff] }
  0x63   :  { %1850 = vmatpush3.bf16.msra.mxu0 %v1849_v10  ;;  %v160_v39 = vld [vmem:[#allocation5 + $0x200] sm:$0xff]  ;;  %v161_v40 = vld [vmem:[#allocation5 + $0x208] sm:$0xff]  ;;  %v1923_v42 = vpack.c.bf16 %v209_v35, %v208_v34  ;;  %v179_v45 = vld [vmem:[#allocation5 + $0x298] sm:$0xff] }
  0x64   :  { %1852 = vmatprep.subr.bf16.mxu0 %v1851_v14  ;;  %v192_v41 = vld [vmem:[#allocation5 + $0x300] sm:$0xff]  ;;  %v193_v43 = vld [vmem:[#allocation5 + $0x308] sm:$0xff]  ;;  %v210_v46 = vld [vmem:[#allocation5 + $0x390] sm:$0xff]  ;;  %v1893_v49 = vpack.c.bf16 %v161_v40, %v160_v39  ;;  %v1895_v52 = vpack.c.bf16 %v179_v45, %v178_v44 }
  0x65   :  { %1882 = vmatpush3.bf16.msra.mxu1 %v1881_v13  ;;  %v211_v47 = vld [vmem:[#allocation5 + $0x398] sm:$0xff]  ;;  %v72_v48 = vld [vmem:[#allocation2] sm:$0xff]  ;;  %v74_v50 = vld [vmem:[#allocation2 + $0x10] sm:$0xff]  ;;  %v1925_v51 = vpack.c.bf16 %v193_v43, %v192_v41 }
  0x66   :  { %1884 = vmatprep.subr.bf16.mxu1 %v1883_v18  ;;  %v162_v53 = vld [vmem:[#allocation5 + $0x210] sm:$0xff]  ;;  %v163_v54 = vld [vmem:[#allocation5 + $0x218] sm:$0xff]  ;;  %v1927_v56 = vpack.c.bf16 %v211_v47, %v210_v46  ;;  %v180_v58 = vld [vmem:[#allocation5 + $0x2a0] sm:$0xff] }
  0x67   :  { %1854 = vmatpush3.bf16.msra.mxu0 %v1853_v24  ;;  %v194_v55 = vld [vmem:[#allocation5 + $0x310] sm:$0xff]  ;;  %v195_v57 = vld [vmem:[#allocation5 + $0x318] sm:$0xff]  ;;  %v181_v59 = vld [vmem:[#allocation5 + $0x2a8] sm:$0xff]  ;;  %v1897_v62 = vpack.c.bf16 %v163_v54, %v162_v53 }
  0x68   :  { %1856 = vmatprep.subr.bf16.mxu0 %v1855_v26  ;;  %v212_v60 = vld [vmem:[#allocation5 + $0x3a0] sm:$0xff]  ;;  %v213_v61 = vld [vmem:[#allocation5 + $0x3a8] sm:$0xff]  ;;  %v1929_v63 = vpack.c.bf16 %v195_v57, %v194_v55  ;;  %v1899_v0 = vpack.c.bf16 %v181_v59, %v180_v58  ;;  %v182_v6 = vld [vmem:[#allocation5 + $0x2b0] sm:$0xff] }
  0x69   :  { %1886 = vmatpush3.bf16.msra.mxu1 %v1885_v25  ;;  %v164_v1 = vld [vmem:[#allocation5 + $0x220] sm:$0xff]  ;;  %v165_v2 = vld [vmem:[#allocation5 + $0x228] sm:$0xff]  ;;  %v1931_v4 = vpack.c.bf16 %v213_v61, %v212_v60  ;;  %v183_v7 = vld [vmem:[#allocation5 + $0x2b8] sm:$0xff] }
  0x6a   :  { %1888 = vmatprep.subr.bf16.mxu1 %v1887_v30  ;;  %v196_v3 = vld [vmem:[#allocation5 + $0x320] sm:$0xff]  ;;  %v197_v5 = vld [vmem:[#allocation5 + $0x328] sm:$0xff]  ;;  %v214_v8 = vld [vmem:[#allocation5 + $0x3b0] sm:$0xff]  ;;  %v1901_v10 = vpack.c.bf16 %v165_v2, %v164_v1  ;;  %v1903_v12 = vpack.c.bf16 %v183_v7, %v182_v6 }
  0x6b   :  { %1858 = vmatpush3.bf16.msra.mxu0 %v1857_v36  ;;  %v215_v9 = vld [vmem:[#allocation5 + $0x3b8] sm:$0xff]  ;;  %v1933_v11 = vpack.c.bf16 %v197_v5, %v196_v3  ;;  %v166_v13 = vld [vmem:[#allocation5 + $0x230] sm:$0xff]  ;;  %v184_v18 = vld [vmem:[#allocation5 + $0x2c0] sm:$0xff] }
  0x6c   :  { %1892 = vmatprep.subr.bf16.mxu0 %v1891_v38  ;;  %v167_v14 = vld [vmem:[#allocation5 + $0x238] sm:$0xff]  ;;  %v198_v15 = vld [vmem:[#allocation5 + $0x330] sm:$0xff]  ;;  %v1935_v16 = vpack.c.bf16 %v215_v9, %v214_v8  ;;  %v185_v19 = vld [vmem:[#allocation5 + $0x2c8] sm:$0xff] }
  0x6d   :  { %1890 = vmatpush3.bf16.msra.mxu1 %v1889_v37  ;;  %v199_v17 = vld [vmem:[#allocation5 + $0x338] sm:$0xff]  ;;  %v216_v20 = vld [vmem:[#allocation5 + $0x3c0] sm:$0xff]  ;;  %v217_v21 = vld [vmem:[#allocation5 + $0x3c8] sm:$0xff]  ;;  %v1905_v22 = vpack.c.bf16 %v167_v14, %v166_v13  ;;  %v1907_v26 = vpack.c.bf16 %v185_v19, %v184_v18 }
  0x6e   :  { %1924 = vmatprep.subr.bf16.mxu1 %v1923_v42  ;;  %552 = vmatmul.mubr.f32.vlgmr.msra.gmra.mrb[0].mxu0 %v72_v48  ;;  %v168_v23 = vld [vmem:[#allocation5 + $0x240] sm:$0xff]  ;;  %v77_v24 = vld [vmem:[#allocation2 + $0x28] sm:$0xff]  ;;  %v1937_v25 = vpack.c.bf16 %v199_v17, %v198_v15  ;;  %v79_v29 = vld [vmem:[#allocation2 + $0x38] sm:$0xff]  ;;  %v1939_v30 = vpack.c.bf16 %v217_v21, %v216_v20 }
  0x6f   :  { %1894 = vmatpush3.bf16.msra.mxu0 %v1893_v49  ;;  %v169_v27 = vld [vmem:[#allocation5 + $0x248] sm:$0xff]  ;;  %v200_v28 = vld [vmem:[#allocation5 + $0x340] sm:$0xff]  ;;  %v186_v32 = vld [vmem:[#allocation5 + $0x2d0] sm:$0xff]  ;;  %691 = vmatprep.mubr.f32.mxu0 %v77_v24 }
  0x70   :  { %622 = vmatmul.mubr.f32.vlgmr.msra.gmra.mrb[0].mxu1 %v74_v50  ;;  %1896 = vmatprep.subr.bf16.mxu0 %v1895_v52  ;;  %v201_v31 = vld [vmem:[#allocation5 + $0x348] sm:$0xff]  ;;  %v187_v33 = vld [vmem:[#allocation5 + $0x2d8] sm:$0xff]  ;;  %v218_v34 = vld [vmem:[#allocation5 + $0x3d0] sm:$0xff]  ;;  %v1909_v36 = vpack.c.bf16 %v169_v27, %v168_v23 }
  0x71   :  { %1926 = vmatpush3.bf16.msra.mxu1 %v1925_v51  ;;  %v219_v35 = vld [vmem:[#allocation5 + $0x3d8] sm:$0xff]  ;;  %761 = vmatprep.mubr.f32.mxu1 %v79_v29  ;;  %v1941_v37 = vpack.c.bf16 %v201_v31, %v200_v28  ;;  %v1911_v38 = vpack.c.bf16 %v187_v33, %v186_v32  ;;  %v170_v39 = vld [vmem:[#allocation5 + $0x250] sm:$0xff]  ;;  %v188_v44 = vld [vmem:[#allocation5 + $0x2e0] sm:$0xff] }
  0x72   :  { %1928 = vmatprep.subr.bf16.mxu1 %v1927_v56  ;;  %v171_v40 = vld [vmem:[#allocation5 + $0x258] sm:$0xff]  ;;  %v202_v41 = vld [vmem:[#allocation5 + $0x350] sm:$0xff]  ;;  %v1943_v42 = vpack.c.bf16 %v219_v35, %v218_v34  ;;  %v189_v45 = vld [vmem:[#allocation5 + $0x2e8] sm:$0xff] }
  0x73   :  { %1898 = vmatpush3.bf16.msra.mxu0 %v1897_v62  ;;  %v203_v43 = vld [vmem:[#allocation5 + $0x358] sm:$0xff]  ;;  %v220_v46 = vld [vmem:[#allocation5 + $0x3e0] sm:$0xff]  ;;  %v221_v47 = vld [vmem:[#allocation5 + $0x3e8] sm:$0xff]  ;;  %v1913_v48 = vpack.c.bf16 %v171_v40, %v170_v39  ;;  %v1915_v50 = vpack.c.bf16 %v189_v45, %v188_v44 }
  0x74   :  { %1900 = vmatprep.subr.bf16.mxu0 %v1899_v0  ;;  %v1945_v49 = vpack.c.bf16 %v203_v43, %v202_v41  ;;  %v172_v51 = vld [vmem:[#allocation5 + $0x260] sm:$0xff]  ;;  %v173_v52 = vld [vmem:[#allocation5 + $0x268] sm:$0xff]  ;;  %v1947_v54 = vpack.c.bf16 %v221_v47, %v220_v46  ;;  %v190_v56 = vld [vmem:[#allocation5 + $0x2f0] sm:$0xff] }
  0x75   :  { %1930 = vmatpush3.bf16.msra.mxu1 %v1929_v63  ;;  %v204_v53 = vld [vmem:[#allocation5 + $0x360] sm:$0xff]  ;;  %v205_v55 = vld [vmem:[#allocation5 + $0x368] sm:$0xff]  ;;  %v191_v57 = vld [vmem:[#allocation5 + $0x2f8] sm:$0xff]  ;;  %v1917_v60 = vpack.c.bf16 %v173_v52, %v172_v51 }
  0x76   :  { %1932 = vmatprep.subr.bf16.mxu1 %v1931_v4  ;;  %v222_v58 = vld [vmem:[#allocation5 + $0x3f0] sm:$0xff]  ;;  %v223_v59 = vld [vmem:[#allocation5 + $0x3f8] sm:$0xff]  ;;  %v1949_v61 = vpack.c.bf16 %v205_v55, %v204_v53  ;;  %v1919_v62 = vpack.c.bf16 %v191_v57, %v190_v56  ;;  %v240_v4 = vld [vmem:[#allocation5 + $0x480] sm:$0xff] }
  0x77   :  { %1902 = vmatpush3.bf16.msra.mxu0 %v1901_v10  ;;  %v174_v63 = vld [vmem:[#allocation5 + $0x270] sm:$0xff]  ;;  %v175_v0 = vld [vmem:[#allocation5 + $0x278] sm:$0xff]  ;;  %v1951_v2 = vpack.c.bf16 %v223_v59, %v222_v58  ;;  %v241_v5 = vld [vmem:[#allocation5 + $0x488] sm:$0xff] }
  0x78   :  { %1904 = vmatprep.subr.bf16.mxu0 %v1903_v12  ;;  %v206_v1 = vld [vmem:[#allocation5 + $0x370] sm:$0xff]  ;;  %v207_v3 = vld [vmem:[#allocation5 + $0x378] sm:$0xff]  ;;  %v272_v6 = vld [vmem:[#allocation5 + $0x580] sm:$0xff]  ;;  %v1921_v8 = vpack.c.bf16 %v175_v0, %v174_v63  ;;  %v1955_v10 = vpack.c.bf16 %v241_v5, %v240_v4 }
  0x79   :  { %1934 = vmatpush3.bf16.msra.mxu1 %v1933_v11  ;;  %v273_v7 = vld [vmem:[#allocation5 + $0x588] sm:$0xff]  ;;  %v1953_v9 = vpack.c.bf16 %v207_v3, %v206_v1  ;;  %v224_v11 = vld [vmem:[#allocation5 + $0x400] sm:$0xff]  ;;  %v243_v17 = vld [vmem:[#allocation5 + $0x498] sm:$0xff] }
  0x7a   :  { %1936 = vmatprep.subr.bf16.mxu1 %v1935_v16  ;;  %v225_v12 = vld [vmem:[#allocation5 + $0x408] sm:$0xff]  ;;  %v256_v13 = vld [vmem:[#allocation5 + $0x500] sm:$0xff]  ;;  %v1987_v14 = vpack.c.bf16 %v273_v7, %v272_v6  ;;  %v242_v16 = vld [vmem:[#allocation5 + $0x490] sm:$0xff] }
  0x7b   :  { %1906 = vmatpush3.bf16.msra.mxu0 %v1905_v22  ;;  %v257_v15 = vld [vmem:[#allocation5 + $0x508] sm:$0xff]  ;;  %v274_v18 = vld [vmem:[#allocation5 + $0x590] sm:$0xff]  ;;  %v275_v19 = vld [vmem:[#allocation5 + $0x598] sm:$0xff]  ;;  %v1957_v21 = vpack.c.bf16 %v225_v12, %v224_v11  ;;  %v1959_v24 = vpack.c.bf16 %v243_v17, %v242_v16 }
  0x7c   :  { %1908 = vmatprep.subr.bf16.mxu0 %v1907_v26  ;;  %v76_v20 = vld [vmem:[#allocation2 + $0x20] sm:$0xff]  ;;  %v78_v22 = vld [vmem:[#allocation2 + $0x30] sm:$0xff]  ;;  %v1989_v23 = vpack.c.bf16 %v257_v15, %v256_v13  ;;  %v227_v26 = vld [vmem:[#allocation5 + $0x418] sm:$0xff]  ;;  %v1991_v28 = vpack.c.bf16 %v275_v19, %v274_v18 }
  0x7d   :  { %1938 = vmatpush3.bf16.msra.mxu1 %v1937_v25  ;;  %v226_v25 = vld [vmem:[#allocation5 + $0x410] sm:$0xff]  ;;  %v259_v29 = vld [vmem:[#allocation5 + $0x518] sm:$0xff]  ;;  %v245_v31 = vld [vmem:[#allocation5 + $0x4a8] sm:$0xff] }
  0x7e   :  { %1940 = vmatprep.subr.bf16.mxu1 %v1939_v30  ;;  %v258_v27 = vld [vmem:[#allocation5 + $0x510] sm:$0xff]  ;;  %v244_v30 = vld [vmem:[#allocation5 + $0x4a0] sm:$0xff]  ;;  %v277_v33 = vld [vmem:[#allocation5 + $0x5a8] sm:$0xff]  ;;  %v1961_v35 = vpack.c.bf16 %v227_v26, %v226_v25 }
  0x7f   :  { %1910 = vmatpush3.bf16.msra.mxu0 %v1909_v36  ;;  %v276_v32 = vld [vmem:[#allocation5 + $0x5a0] sm:$0xff]  ;;  %v81_v34 = vld [vmem:[#allocation2 + $0x48] sm:$0xff]  ;;  %v83_v36 = vld [vmem:[#allocation2 + $0x58] sm:$0xff] }
  0x80   :  { %1912 = vmatprep.subr.bf16.mxu0 %v1911_v38  ;;  %v1963_v38 = vpack.c.bf16 %v245_v31, %v244_v30  ;;  %v228_v39 = vld [vmem:[#allocation5 + $0x420] sm:$0xff]  ;;  %v229_v40 = vld [vmem:[#allocation5 + $0x428] sm:$0xff]  ;;  %v246_v44 = vld [vmem:[#allocation5 + $0x4b0] sm:$0xff] }
  0x81   :  { %1942 = vmatpush3.bf16.msra.mxu1 %v1941_v37  ;;  %v1993_v37 = vpack.c.bf16 %v259_v29, %v258_v27  ;;  %v260_v41 = vld [vmem:[#allocation5 + $0x520] sm:$0xff]  ;;  %v261_v43 = vld [vmem:[#allocation5 + $0x528] sm:$0xff]  ;;  %v247_v45 = vld [vmem:[#allocation5 + $0x4b8] sm:$0xff] }
  0x82   :  { %1944 = vmatprep.subr.bf16.mxu1 %v1943_v42  ;;  %v1995_v42 = vpack.c.bf16 %v277_v33, %v276_v32  ;;  %v278_v46 = vld [vmem:[#allocation5 + $0x5b0] sm:$0xff]  ;;  %v279_v47 = vld [vmem:[#allocation5 + $0x5b8] sm:$0xff]  ;;  %v248_v56 = vld [vmem:[#allocation5 + $0x4c0] sm:$0xff] }
  0x83   :  { %1914 = vmatpush3.bf16.msra.mxu0 %v1913_v48  ;;  %v1965_v48 = vpack.c.bf16 %v229_v40, %v228_v39  ;;  %v230_v51 = vld [vmem:[#allocation5 + $0x430] sm:$0xff]  ;;  %v231_v52 = vld [vmem:[#allocation5 + $0x438] sm:$0xff]  ;;  %v249_v57 = vld [vmem:[#allocation5 + $0x4c8] sm:$0xff] }
  0x84   :  { %1916 = vmatprep.subr.bf16.mxu0 %v1915_v50  ;;  %v1967_v50 = vpack.c.bf16 %v247_v45, %v246_v44  ;;  %v262_v53 = vld [vmem:[#allocation5 + $0x530] sm:$0xff]  ;;  %v263_v55 = vld [vmem:[#allocation5 + $0x538] sm:$0xff]  ;;  %v280_v58 = vld [vmem:[#allocation5 + $0x5c0] sm:$0xff] }
  0x85   :  { %1946 = vmatpush3.bf16.msra.mxu1 %v1945_v49  ;;  %v1997_v49 = vpack.c.bf16 %v261_v43, %v260_v41  ;;  %v281_v59 = vld [vmem:[#allocation5 + $0x5c8] sm:$0xff]  ;;  %v232_v63 = vld [vmem:[#allocation5 + $0x440] sm:$0xff]  ;;  %v250_v4 = vld [vmem:[#allocation5 + $0x4d0] sm:$0xff] }
  0x86   :  { %1948 = vmatprep.subr.bf16.mxu1 %v1947_v54  ;;  %v1999_v54 = vpack.c.bf16 %v279_v47, %v278_v46  ;;  %v233_v0 = vld [vmem:[#allocation5 + $0x448] sm:$0xff]  ;;  %v264_v1 = vld [vmem:[#allocation5 + $0x540] sm:$0xff]  ;;  %v251_v5 = vld [vmem:[#allocation5 + $0x4d8] sm:$0xff] }
  0x87   :  { %1918 = vmatpush3.bf16.msra.mxu0 %v1917_v60  ;;  %v1969_v60 = vpack.c.bf16 %v231_v52, %v230_v51  ;;  %v265_v3 = vld [vmem:[#allocation5 + $0x548] sm:$0xff]  ;;  %v282_v6 = vld [vmem:[#allocation5 + $0x5d0] sm:$0xff]  ;;  %v283_v7 = vld [vmem:[#allocation5 + $0x5d8] sm:$0xff] }
  0x88   :  { %1920 = vmatprep.subr.bf16.mxu0 %v1919_v62  ;;  %v1971_v62 = vpack.c.bf16 %v249_v57, %v248_v56  ;;  %v234_v11 = vld [vmem:[#allocation5 + $0x450] sm:$0xff]  ;;  %v235_v12 = vld [vmem:[#allocation5 + $0x458] sm:$0xff]  ;;  %v252_v16 = vld [vmem:[#allocation5 + $0x4e0] sm:$0xff] }
  0x89   :  { %1950 = vmatpush3.bf16.msra.mxu1 %v1949_v61  ;;  %v2001_v61 = vpack.c.bf16 %v263_v55, %v262_v53  ;;  %v266_v13 = vld [vmem:[#allocation5 + $0x550] sm:$0xff]  ;;  %v267_v15 = vld [vmem:[#allocation5 + $0x558] sm:$0xff]  ;;  %v253_v17 = vld [vmem:[#allocation5 + $0x4e8] sm:$0xff] }
  0x8a   :  { %1952 = vmatprep.subr.bf16.mxu1 %v1951_v2  ;;  %v2003_v2 = vpack.c.bf16 %v281_v59, %v280_v58  ;;  %v284_v18 = vld [vmem:[#allocation5 + $0x5e0] sm:$0xff]  ;;  %v285_v19 = vld [vmem:[#allocation5 + $0x5e8] sm:$0xff]  ;;  %v255_v29 = vld [vmem:[#allocation5 + $0x4f8] sm:$0xff] }
  0x8b   :  { %1922 = vmatpush3.bf16.msra.mxu0 %v1921_v8  ;;  %v1973_v8 = vpack.c.bf16 %v233_v0, %v232_v63  ;;  %v268_v25 = vld [vmem:[#allocation5 + $0x560] sm:$0xff]  ;;  %v2011_v26 = vpack.c.bf16 %v285_v19, %v284_v18  ;;  %v269_v27 = vld [vmem:[#allocation5 + $0x568] sm:$0xff]  ;;  %v286_v30 = vld [vmem:[#allocation5 + $0x5f0] sm:$0xff] }
  0x8c   :  { %1956 = vmatprep.subr.bf16.mxu0 %v1955_v10  ;;  %v1975_v10 = vpack.c.bf16 %v251_v5, %v250_v4  ;;  %v287_v31 = vld [vmem:[#allocation5 + $0x5f8] sm:$0xff]  ;;  %v2013_v33 = vpack.c.bf16 %v269_v27, %v268_v25  ;;  %v304_v40 = vld [vmem:[#allocation5 + $0x680] sm:$0xff]  ;;  %v305_v41 = vld [vmem:[#allocation5 + $0x688] sm:$0xff] }
  0x8d   :  { %1954 = vmatpush3.bf16.msra.mxu1 %v1953_v9  ;;  %v2005_v9 = vpack.c.bf16 %v265_v3, %v264_v1  ;;  %v271_v39 = vld [vmem:[#allocation5 + $0x578] sm:$0xff]  ;;  %v337_v43 = vld [vmem:[#allocation5 + $0x788] sm:$0xff]  ;;  %v2019_v46 = vpack.c.bf16 %v305_v41, %v304_v40  ;;  %v288_v47 = vld [vmem:[#allocation5 + $0x600] sm:$0xff] }
  0x8e   :  { %1988 = vmatprep.subr.bf16.mxu1 %v1987_v14  ;;  %692 = vmatmul.mubr.f32.vlgmr.msra.gmra.mrb[2].mxu0 %v76_v20  ;;  %v2007_v14 = vpack.c.bf16 %v283_v7, %v282_v6  ;;  %v1977_v20 = vpack.c.bf16 %v235_v12, %v234_v11  ;;  %v321_v51 = vld [vmem:[#allocation5 + $0x708] sm:$0xff]  ;;  %v306_v52 = vld [vmem:[#allocation5 + $0x690] sm:$0xff]  ;;  %v307_v53 = vld [vmem:[#allocation5 + $0x698] sm:$0xff] }
  0x8f   :  { %1958 = vmatpush3.bf16.msra.mxu0 %v1957_v21  ;;  %831 = vmatprep.mubr.f32.mxu0 %v81_v34  ;;  %v2009_v21 = vpack.c.bf16 %v267_v15, %v266_v13  ;;  %v339_v55 = vld [vmem:[#allocation5 + $0x798] sm:$0xff]  ;;  %v80_v56 = vld [vmem:[#allocation2 + $0x40] sm:$0xff]  ;;  %v82_v58 = vld [vmem:[#allocation2 + $0x50] sm:$0xff] }
  0x90   :  { %762 = vmatmul.mubr.f32.vlgmr.msra.gmra.mrb[2].mxu1 %v78_v22  ;;  %1960 = vmatprep.subr.bf16.mxu0 %v1959_v24  ;;  %v1979_v22 = vpack.c.bf16 %v253_v17, %v252_v16  ;;  %v237_v24 = vld [vmem:[#allocation5 + $0x468] sm:$0xff]  ;;  %v322_v63 = vld [vmem:[#allocation5 + $0x710] sm:$0xff]  ;;  %v323_v1 = vld [vmem:[#allocation5 + $0x718] sm:$0xff] }
  0x91   :  { %1990 = vmatpush3.bf16.msra.mxu1 %v1989_v23  ;;  %901 = vmatprep.mubr.f32.mxu1 %v83_v36  ;;  %v236_v23 = vld [vmem:[#allocation5 + $0x460] sm:$0xff]  ;;  %v239_v36 = vld [vmem:[#allocation5 + $0x478] sm:$0xff]  ;;  %v309_v3 = vld [vmem:[#allocation5 + $0x6a8] sm:$0xff] }
  0x92   :  { %1992 = vmatprep.subr.bf16.mxu1 %v1991_v28  ;;  %v254_v28 = vld [vmem:[#allocation5 + $0x4f0] sm:$0xff]  ;;  %v1981_v32 = vpack.c.bf16 %v237_v24, %v236_v23  ;;  %v340_v4 = vld [vmem:[#allocation5 + $0x7a0] sm:$0xff]  ;;  %v341_v5 = vld [vmem:[#allocation5 + $0x7a8] sm:$0xff] }
  0x93   :  { %1962 = vmatpush3.bf16.msra.mxu0 %v1961_v35  ;;  %v1983_v34 = vpack.c.bf16 %v255_v29, %v254_v28  ;;  %v238_v35 = vld [vmem:[#allocation5 + $0x470] sm:$0xff]  ;;  %v85_v6 = vld [vmem:[#allocation2 + $0x68] sm:$0xff]  ;;  %v292_v11 = vld [vmem:[#allocation5 + $0x620] sm:$0xff] }
  0x94   :  { %1964 = vmatprep.subr.bf16.mxu0 %v1963_v38  ;;  %v2015_v38 = vpack.c.bf16 %v287_v31, %v286_v30  ;;  %v1985_v44 = vpack.c.bf16 %v239_v36, %v238_v35  ;;  %v293_v12 = vld [vmem:[#allocation5 + $0x628] sm:$0xff]  ;;  %v324_v13 = vld [vmem:[#allocation5 + $0x720] sm:$0xff]  ;;  %v310_v16 = vld [vmem:[#allocation5 + $0x6b0] sm:$0xff] }
  0x95   :  { %1994 = vmatpush3.bf16.msra.mxu1 %v1993_v37  ;;  %v270_v37 = vld [vmem:[#allocation5 + $0x570] sm:$0xff]  ;;  %v325_v15 = vld [vmem:[#allocation5 + $0x728] sm:$0xff]  ;;  %v311_v17 = vld [vmem:[#allocation5 + $0x6b8] sm:$0xff] }
  0x96   :  { %1996 = vmatprep.subr.bf16.mxu1 %v1995_v42  ;;  %v336_v42 = vld [vmem:[#allocation5 + $0x780] sm:$0xff]  ;;  %v2017_v45 = vpack.c.bf16 %v271_v39, %v270_v37  ;;  %v342_v18 = vld [vmem:[#allocation5 + $0x7b0] sm:$0xff]  ;;  %v343_v19 = vld [vmem:[#allocation5 + $0x7b8] sm:$0xff] }
  0x97   :  { %1966 = vmatpush3.bf16.msra.mxu0 %v1965_v48  ;;  %v289_v48 = vld [vmem:[#allocation5 + $0x608] sm:$0xff]  ;;  %v294_v23 = vld [vmem:[#allocation5 + $0x630] sm:$0xff]  ;;  %v295_v24 = vld [vmem:[#allocation5 + $0x638] sm:$0xff] }
  0x98   :  { %1968 = vmatprep.subr.bf16.mxu0 %v1967_v50  ;;  %v2051_v50 = vpack.c.bf16 %v337_v43, %v336_v42  ;;  %v2021_v57 = vpack.c.bf16 %v289_v48, %v288_v47  ;;  %v326_v25 = vld [vmem:[#allocation5 + $0x730] sm:$0xff]  ;;  %v327_v27 = vld [vmem:[#allocation5 + $0x738] sm:$0xff]  ;;  %v312_v28 = vld [vmem:[#allocation5 + $0x6c0] sm:$0xff] }
  0x99   :  { %1998 = vmatpush3.bf16.msra.mxu1 %v1997_v49  ;;  %v320_v49 = vld [vmem:[#allocation5 + $0x700] sm:$0xff]  ;;  %v313_v29 = vld [vmem:[#allocation5 + $0x6c8] sm:$0xff]  ;;  %v314_v40 = vld [vmem:[#allocation5 + $0x6d0] sm:$0xff] }
  0x9a   :  { %2000 = vmatprep.subr.bf16.mxu1 %v1999_v54  ;;  %v338_v54 = vld [vmem:[#allocation5 + $0x790] sm:$0xff]  ;;  %v2053_v59 = vpack.c.bf16 %v321_v51, %v320_v49  ;;  %v344_v30 = vld [vmem:[#allocation5 + $0x7c0] sm:$0xff]  ;;  %v345_v31 = vld [vmem:[#allocation5 + $0x7c8] sm:$0xff] }
  0x9b   :  { %1970 = vmatpush3.bf16.msra.mxu0 %v1969_v60  ;;  %v2023_v60 = vpack.c.bf16 %v307_v53, %v306_v52  ;;  %v2055_v0 = vpack.c.bf16 %v339_v55, %v338_v54  ;;  %v296_v35 = vld [vmem:[#allocation5 + $0x640] sm:$0xff]  ;;  %v297_v36 = vld [vmem:[#allocation5 + $0x648] sm:$0xff]  ;;  %v315_v41 = vld [vmem:[#allocation5 + $0x6d8] sm:$0xff] }
  0x9c   :  { %1972 = vmatprep.subr.bf16.mxu0 %v1971_v62  ;;  %v291_v62 = vld [vmem:[#allocation5 + $0x618] sm:$0xff]  ;;  %v328_v37 = vld [vmem:[#allocation5 + $0x740] sm:$0xff]  ;;  %v329_v39 = vld [vmem:[#allocation5 + $0x748] sm:$0xff] }
  0x9d   :  { %2002 = vmatpush3.bf16.msra.mxu1 %v2001_v61  ;;  %v290_v61 = vld [vmem:[#allocation5 + $0x610] sm:$0xff]  ;;  %v347_v43 = vld [vmem:[#allocation5 + $0x7d8] sm:$0xff]  ;;  %v316_v52 = vld [vmem:[#allocation5 + $0x6e0] sm:$0xff] }
  0x9e   :  { %2004 = vmatprep.subr.bf16.mxu1 %v2003_v2  ;;  %v308_v2 = vld [vmem:[#allocation5 + $0x6a0] sm:$0xff]  ;;  %v2025_v7 = vpack.c.bf16 %v291_v62, %v290_v61  ;;  %v346_v42 = vld [vmem:[#allocation5 + $0x7d0] sm:$0xff]  ;;  %v299_v48 = vld [vmem:[#allocation5 + $0x658] sm:$0xff] }
  0x9f   :  { %1974 = vmatpush3.bf16.msra.mxu0 %v1973_v8  ;;  %v87_v8 = vld [vmem:[#allocation2 + $0x78] sm:$0xff]  ;;  %v298_v47 = vld [vmem:[#allocation5 + $0x650] sm:$0xff]  ;;  %v317_v53 = vld [vmem:[#allocation5 + $0x6e8] sm:$0xff] }
  0xa0   :  { %1976 = vmatprep.subr.bf16.mxu0 %v1975_v10  ;;  %v2027_v10 = vpack.c.bf16 %v309_v3, %v308_v2  ;;  %v330_v49 = vld [vmem:[#allocation5 + $0x750] sm:$0xff]  ;;  %v331_v51 = vld [vmem:[#allocation5 + $0x758] sm:$0xff]  ;;  %v348_v54 = vld [vmem:[#allocation5 + $0x7e0] sm:$0xff] }
  0xa1   :  { %2006 = vmatpush3.bf16.msra.mxu1 %v2005_v9  ;;  %v2057_v9 = vpack.c.bf16 %v323_v1, %v322_v63  ;;  %v349_v55 = vld [vmem:[#allocation5 + $0x7e8] sm:$0xff]  ;;  %v332_v61 = vld [vmem:[#allocation5 + $0x760] sm:$0xff]  ;;  %v319_v1 = vld [vmem:[#allocation5 + $0x6f8] sm:$0xff] }
  0xa2   :  { %2008 = vmatprep.subr.bf16.mxu1 %v2007_v14  ;;  %v2059_v14 = vpack.c.bf16 %v341_v5, %v340_v4  ;;  %v2075_v62 = vpack.c.bf16 %v349_v55, %v348_v54  ;;  %v333_v63 = vld [vmem:[#allocation5 + $0x768] sm:$0xff]  ;;  %v350_v2 = vld [vmem:[#allocation5 + $0x7f0] sm:$0xff]  ;;  %v351_v3 = vld [vmem:[#allocation5 + $0x7f8] sm:$0xff] }
  0xa3   :  { %1978 = vmatpush3.bf16.msra.mxu0 %v1977_v20  ;;  %v2029_v20 = vpack.c.bf16 %v293_v12, %v292_v11  ;;  %v2077_v5 = vpack.c.bf16 %v333_v63, %v332_v61  ;;  %v335_v11 = vld [vmem:[#allocation5 + $0x778] sm:$0xff]  ;;  %v368_v12 = vld [vmem:[#allocation5 + $0x880] sm:$0xff]  ;;  %v406_v54 = vld [vmem:[#allocation5 + $0x9b0] sm:$0xff] }
  0xa4   :  { %1980 = vmatprep.subr.bf16.mxu0 %v1979_v22  ;;  %v2031_v22 = vpack.c.bf16 %v311_v17, %v310_v16  ;;  %v407_v55 = vld [vmem:[#allocation5 + $0x9b8] sm:$0xff]  ;;  %v390_v61 = vld [vmem:[#allocation5 + $0x930] sm:$0xff] }
  0xa5   :  { %2010 = vmatpush3.bf16.msra.mxu1 %v2009_v21  ;;  %v2061_v21 = vpack.c.bf16 %v325_v15, %v324_v13  ;;  %v369_v13 = vld [vmem:[#allocation5 + $0x888] sm:$0xff]  ;;  %v391_v63 = vld [vmem:[#allocation5 + $0x938] sm:$0xff] }
  0xa6   :  { %2012 = vmatprep.subr.bf16.mxu1 %v2011_v26  ;;  %v2063_v26 = vpack.c.bf16 %v343_v19, %v342_v18  ;;  %v401_v15 = vld [vmem:[#allocation5 + $0x988] sm:$0xff]  ;;  %v2083_v18 = vpack.c.bf16 %v369_v13, %v368_v12  ;;  %v352_v19 = vld [vmem:[#allocation5 + $0x800] sm:$0xff]  ;;  %v378_v12 = vld [vmem:[#allocation5 + $0x8d0] sm:$0xff] }
  0xa7   :  { %1982 = vmatpush3.bf16.msra.mxu0 %v1981_v32  ;;  %v2033_v32 = vpack.c.bf16 %v295_v24, %v294_v23  ;;  %v385_v23 = vld [vmem:[#allocation5 + $0x908] sm:$0xff]  ;;  %v370_v24 = vld [vmem:[#allocation5 + $0x890] sm:$0xff]  ;;  %v379_v13 = vld [vmem:[#allocation5 + $0x8d8] sm:$0xff] }
  0xa8   :  { %1984 = vmatprep.subr.bf16.mxu0 %v1983_v34  ;;  %v2035_v34 = vpack.c.bf16 %v313_v29, %v312_v28  ;;  %v84_v28 = vld [vmem:[#allocation2 + $0x60] sm:$0xff] }
  0xa9   :  { %2014 = vmatpush3.bf16.msra.mxu1 %v2013_v33  ;;  %v2065_v33 = vpack.c.bf16 %v327_v27, %v326_v25  ;;  %v371_v25 = vld [vmem:[#allocation5 + $0x898] sm:$0xff] }
  0xaa   :  { %2016 = vmatprep.subr.bf16.mxu1 %v2015_v38  ;;  %v2067_v38 = vpack.c.bf16 %v345_v31, %v344_v30  ;;  %v403_v27 = vld [vmem:[#allocation5 + $0x998] sm:$0xff]  ;;  %v86_v30 = vld [vmem:[#allocation2 + $0x70] sm:$0xff] }
  0xab   :  { %1986 = vmatpush3.bf16.msra.mxu0 %v1985_v44  ;;  %v2037_v44 = vpack.c.bf16 %v297_v36, %v296_v35  ;;  %v386_v35 = vld [vmem:[#allocation5 + $0x910] sm:$0xff] }
  0xac   :  { %2020 = vmatprep.subr.bf16.mxu0 %v2019_v46  ;;  %v2039_v46 = vpack.c.bf16 %v315_v41, %v314_v40  ;;  %v404_v40 = vld [vmem:[#allocation5 + $0x9a0] sm:$0xff]  ;;  %v405_v41 = vld [vmem:[#allocation5 + $0x9a8] sm:$0xff] }
  0xad   :  { %2018 = vmatpush3.bf16.msra.mxu1 %v2017_v45  ;;  %v2069_v45 = vpack.c.bf16 %v329_v39, %v328_v37  ;;  %v387_v37 = vld [vmem:[#allocation5 + $0x918] sm:$0xff]  ;;  %v373_v39 = vld [vmem:[#allocation5 + $0x8a8] sm:$0xff] }
  0xae   :  { %2052 = vmatprep.subr.bf16.mxu1 %v2051_v50  ;;  %832 = vmatmul.mubr.f32.vlgmr.msra.gmra.mrb[4].mxu0 %v80_v56  ;;  %v2071_v50 = vpack.c.bf16 %v347_v43, %v346_v42  ;;  %v2041_v56 = vpack.c.bf16 %v299_v48, %v298_v47  ;;  %v89_v42 = vld [vmem:[#allocation2 + $0x88] sm:$0xff]  ;;  %v356_v47 = vld [vmem:[#allocation5 + $0x820] sm:$0xff] }
  0xaf   :  { %2022 = vmatpush3.bf16.msra.mxu0 %v2021_v57  ;;  %971 = vmatprep.mubr.f32.mxu0 %v85_v6  ;;  %v2073_v57 = vpack.c.bf16 %v331_v51, %v330_v49  ;;  %v357_v48 = vld [vmem:[#allocation5 + $0x828] sm:$0xff]  ;;  %v388_v49 = vld [vmem:[#allocation5 + $0x920] sm:$0xff] }
  0xb0   :  { %902 = vmatmul.mubr.f32.vlgmr.msra.gmra.mrb[4].mxu1 %v82_v58  ;;  %2024 = vmatprep.subr.bf16.mxu0 %v2023_v60  ;;  %v2043_v58 = vpack.c.bf16 %v317_v53, %v316_v52  ;;  %v301_v60 = vld [vmem:[#allocation5 + $0x668] sm:$0xff]  ;;  %v374_v52 = vld [vmem:[#allocation5 + $0x8b0] sm:$0xff]  ;;  %v375_v53 = vld [vmem:[#allocation5 + $0x8b8] sm:$0xff] }
  0xb1   :  { %2054 = vmatpush3.bf16.msra.mxu1 %v2053_v59  ;;  %1041 = vmatprep.mubr.f32.mxu1 %v87_v8  ;;  %v300_v59 = vld [vmem:[#allocation5 + $0x660] sm:$0xff]  ;;  %v303_v8 = vld [vmem:[#allocation5 + $0x678] sm:$0xff]  ;;  %v389_v51 = vld [vmem:[#allocation5 + $0x928] sm:$0xff] }
  0xb2   :  { %2056 = vmatprep.subr.bf16.mxu1 %v2055_v0  ;;  %v318_v0 = vld [vmem:[#allocation5 + $0x6f0] sm:$0xff]  ;;  %v2045_v4 = vpack.c.bf16 %v301_v60, %v300_v59  ;;  %v359_v60 = vld [vmem:[#allocation5 + $0x838] sm:$0xff] }
  0xb3   :  { %2026 = vmatpush3.bf16.msra.mxu0 %v2025_v7  ;;  %v2047_v6 = vpack.c.bf16 %v319_v1, %v318_v0  ;;  %v302_v7 = vld [vmem:[#allocation5 + $0x670] sm:$0xff]  ;;  %v376_v0 = vld [vmem:[#allocation5 + $0x8c0] sm:$0xff]  ;;  %v377_v1 = vld [vmem:[#allocation5 + $0x8c8] sm:$0xff] }
  0xb4   :  { %2028 = vmatprep.subr.bf16.mxu0 %v2027_v10  ;;  %v2079_v10 = vpack.c.bf16 %v351_v3, %v350_v2  ;;  %v2049_v16 = vpack.c.bf16 %v303_v8, %v302_v7  ;;  %v358_v59 = vld [vmem:[#allocation5 + $0x830] sm:$0xff]  ;;  %v408_v2 = vld [vmem:[#allocation5 + $0x9c0] sm:$0xff]  ;;  %v409_v3 = vld [vmem:[#allocation5 + $0x9c8] sm:$0xff] }
  0xb5   :  { %2058 = vmatpush3.bf16.msra.mxu1 %v2057_v9  ;;  %v334_v9 = vld [vmem:[#allocation5 + $0x770] sm:$0xff]  ;;  %v360_v7 = vld [vmem:[#allocation5 + $0x840] sm:$0xff]  ;;  %v361_v8 = vld [vmem:[#allocation5 + $0x848] sm:$0xff] }
  0xb6   :  { %2060 = vmatprep.subr.bf16.mxu1 %v2059_v14  ;;  %v400_v14 = vld [vmem:[#allocation5 + $0x980] sm:$0xff]  ;;  %v2081_v17 = vpack.c.bf16 %v335_v11, %v334_v9  ;;  %v393_v11 = vld [vmem:[#allocation5 + $0x948] sm:$0xff] }
  0xb7   :  { %2030 = vmatpush3.bf16.msra.mxu0 %v2029_v20  ;;  %v353_v20 = vld [vmem:[#allocation5 + $0x808] sm:$0xff]  ;;  %v392_v9 = vld [vmem:[#allocation5 + $0x940] sm:$0xff] }
  0xb8   :  { %2032 = vmatprep.subr.bf16.mxu0 %v2031_v22  ;;  %v2115_v22 = vpack.c.bf16 %v401_v15, %v400_v14  ;;  %v2085_v29 = vpack.c.bf16 %v353_v20, %v352_v19  ;;  %v410_v14 = vld [vmem:[#allocation5 + $0x9d0] sm:$0xff]  ;;  %v411_v15 = vld [vmem:[#allocation5 + $0x9d8] sm:$0xff] }
  0xb9   :  { %2062 = vmatpush3.bf16.msra.mxu1 %v2061_v21  ;;  %v384_v21 = vld [vmem:[#allocation5 + $0x900] sm:$0xff]  ;;  %v362_v19 = vld [vmem:[#allocation5 + $0x850] sm:$0xff]  ;;  %v363_v20 = vld [vmem:[#allocation5 + $0x858] sm:$0xff] }
  0xba   :  { %2064 = vmatprep.subr.bf16.mxu1 %v2063_v26  ;;  %v402_v26 = vld [vmem:[#allocation5 + $0x990] sm:$0xff]  ;;  %v2117_v31 = vpack.c.bf16 %v385_v23, %v384_v21  ;;  %v395_v23 = vld [vmem:[#allocation5 + $0x958] sm:$0xff] }
  0xbb   :  { %2034 = vmatpush3.bf16.msra.mxu0 %v2033_v32  ;;  %v2087_v32 = vpack.c.bf16 %v371_v25, %v370_v24  ;;  %v2119_v36 = vpack.c.bf16 %v403_v27, %v402_v26  ;;  %v394_v21 = vld [vmem:[#allocation5 + $0x950] sm:$0xff]  ;;  %v380_v24 = vld [vmem:[#allocation5 + $0x8e0] sm:$0xff]  ;;  %v381_v25 = vld [vmem:[#allocation5 + $0x8e8] sm:$0xff] }
  0xbc   :  { %2036 = vmatprep.subr.bf16.mxu0 %v2035_v34  ;;  %v355_v34 = vld [vmem:[#allocation5 + $0x818] sm:$0xff]  ;;  %v412_v26 = vld [vmem:[#allocation5 + $0x9e0] sm:$0xff]  ;;  %v413_v27 = vld [vmem:[#allocation5 + $0x9e8] sm:$0xff] }
  0xbd   :  { %2066 = vmatpush3.bf16.msra.mxu1 %v2065_v33  ;;  %v354_v33 = vld [vmem:[#allocation5 + $0x810] sm:$0xff] }
  0xbe   :  { %2068 = vmatprep.subr.bf16.mxu1 %v2067_v38  ;;  %v372_v38 = vld [vmem:[#allocation5 + $0x8a0] sm:$0xff]  ;;  %v2089_v43 = vpack.c.bf16 %v355_v34, %v354_v33  ;;  %v2139_v34 = vpack.c.bf16 %v413_v27, %v412_v26  ;;  %v470_v26 = vld [vmem:[#allocation5 + $0xbb0] sm:$0xff]  ;;  %v471_v27 = vld [vmem:[#allocation5 + $0xbb8] sm:$0xff] }
  0xbf   :  { %2038 = vmatpush3.bf16.msra.mxu0 %v2037_v44  ;;  %v91_v44 = vld [vmem:[#allocation2 + $0x98] sm:$0xff]  ;;  %v396_v33 = vld [vmem:[#allocation5 + $0x960] sm:$0xff] }
  0xc0   :  { %2040 = vmatprep.subr.bf16.mxu0 %v2039_v46  ;;  %v2091_v46 = vpack.c.bf16 %v373_v39, %v372_v38  ;;  %v414_v38 = vld [vmem:[#allocation5 + $0x9f0] sm:$0xff]  ;;  %v415_v39 = vld [vmem:[#allocation5 + $0x9f8] sm:$0xff] }
  0xc1   :  { %2070 = vmatpush3.bf16.msra.mxu1 %v2069_v45  ;;  %v2121_v45 = vpack.c.bf16 %v387_v37, %v386_v35  ;;  %v397_v35 = vld [vmem:[#allocation5 + $0x968] sm:$0xff]  ;;  %v383_v37 = vld [vmem:[#allocation5 + $0x8f8] sm:$0xff] }
  0xc2   :  { %2072 = vmatprep.subr.bf16.mxu1 %v2071_v50  ;;  %v2123_v50 = vpack.c.bf16 %v405_v41, %v404_v40  ;;  %v2141_v41 = vpack.c.bf16 %v397_v35, %v396_v33  ;;  %v454_v33 = vld [vmem:[#allocation5 + $0xb30] sm:$0xff]  ;;  %v455_v35 = vld [vmem:[#allocation5 + $0xb38] sm:$0xff] }
  0xc3   :  { %2042 = vmatpush3.bf16.msra.mxu0 %v2041_v56  ;;  %v2093_v56 = vpack.c.bf16 %v357_v48, %v356_v47  ;;  %v399_v47 = vld [vmem:[#allocation5 + $0x978] sm:$0xff]  ;;  %v432_v48 = vld [vmem:[#allocation5 + $0xa80] sm:$0xff] }
  0xc4   :  { %2044 = vmatprep.subr.bf16.mxu0 %v2043_v58  ;;  %v2095_v58 = vpack.c.bf16 %v375_v53, %v374_v52 }
  0xc5   :  { %2074 = vmatpush3.bf16.msra.mxu1 %v2073_v57  ;;  %v2125_v57 = vpack.c.bf16 %v389_v51, %v388_v49  ;;  %v433_v49 = vld [vmem:[#allocation5 + $0xa88] sm:$0xff] }
  0xc6   :  { %2076 = vmatprep.subr.bf16.mxu1 %v2075_v62  ;;  %v2127_v62 = vpack.c.bf16 %v407_v55, %v406_v54  ;;  %v465_v51 = vld [vmem:[#allocation5 + $0xb88] sm:$0xff]  ;;  %v2147_v54 = vpack.c.bf16 %v433_v49, %v432_v48  ;;  %v416_v55 = vld [vmem:[#allocation5 + $0xa00] sm:$0xff]  ;;  %v442_v48 = vld [vmem:[#allocation5 + $0xad0] sm:$0xff] }
  0xc7   :  { %2046 = vmatpush3.bf16.msra.mxu0 %v2045_v4  ;;  %v2097_v4 = vpack.c.bf16 %v359_v60, %v358_v59  ;;  %v449_v59 = vld [vmem:[#allocation5 + $0xb08] sm:$0xff]  ;;  %v434_v60 = vld [vmem:[#allocation5 + $0xa90] sm:$0xff]  ;;  %v443_v49 = vld [vmem:[#allocation5 + $0xad8] sm:$0xff] }
  0xc8   :  { %2048 = vmatprep.subr.bf16.mxu0 %v2047_v6  ;;  %v2099_v6 = vpack.c.bf16 %v377_v1, %v376_v0  ;;  %v88_v0 = vld [vmem:[#allocation2 + $0x80] sm:$0xff] }
  0xc9   :  { %2078 = vmatpush3.bf16.msra.mxu1 %v2077_v5  ;;  %v2129_v5 = vpack.c.bf16 %v391_v63, %v390_v61  ;;  %v435_v61 = vld [vmem:[#allocation5 + $0xa98] sm:$0xff] }
  0xca   :  { %2080 = vmatprep.subr.bf16.mxu1 %v2079_v10  ;;  %v2131_v10 = vpack.c.bf16 %v409_v3, %v408_v2  ;;  %v467_v63 = vld [vmem:[#allocation5 + $0xb98] sm:$0xff]  ;;  %v90_v2 = vld [vmem:[#allocation2 + $0x90] sm:$0xff] }
  0xcb   :  { %2050 = vmatpush3.bf16.msra.mxu0 %v2049_v16  ;;  %v2101_v16 = vpack.c.bf16 %v361_v8, %v360_v7  ;;  %v450_v7 = vld [vmem:[#allocation5 + $0xb10] sm:$0xff] }
  0xcc   :  { %2084 = vmatprep.subr.bf16.mxu0 %v2083_v18  ;;  %v2103_v18 = vpack.c.bf16 %v379_v13, %v378_v12  ;;  %v468_v12 = vld [vmem:[#allocation5 + $0xba0] sm:$0xff]  ;;  %v469_v13 = vld [vmem:[#allocation5 + $0xba8] sm:$0xff] }
  0xcd   :  { %2082 = vmatpush3.bf16.msra.mxu1 %v2081_v17  ;;  %v2133_v17 = vpack.c.bf16 %v393_v11, %v392_v9  ;;  %v451_v9 = vld [vmem:[#allocation5 + $0xb18] sm:$0xff]  ;;  %v437_v11 = vld [vmem:[#allocation5 + $0xaa8] sm:$0xff] }
  0xce   :  { %2116 = vmatprep.subr.bf16.mxu1 %v2115_v22  ;;  %972 = vmatmul.mubr.f32.vlgmr.msra.gmra.mrb[6].mxu0 %v84_v28  ;;  %v2135_v22 = vpack.c.bf16 %v411_v15, %v410_v14  ;;  %v2105_v28 = vpack.c.bf16 %v363_v20, %v362_v19  ;;  %v93_v14 = vld [vmem:[#allocation2 + $0xa8] sm:$0xff]  ;;  %v420_v19 = vld [vmem:[#allocation5 + $0xa20] sm:$0xff] }
  0xcf   :  { %2086 = vmatpush3.bf16.msra.mxu0 %v2085_v29  ;;  %1111 = vmatprep.mubr.f32.mxu0 %v89_v42  ;;  %v2137_v29 = vpack.c.bf16 %v395_v23, %v394_v21  ;;  %v421_v20 = vld [vmem:[#allocation5 + $0xa28] sm:$0xff]  ;;  %v452_v21 = vld [vmem:[#allocation5 + $0xb20] sm:$0xff] }
  0xd0   :  { %1042 = vmatmul.mubr.f32.vlgmr.msra.gmra.mrb[6].mxu1 %v86_v30  ;;  %2088 = vmatprep.subr.bf16.mxu0 %v2087_v32  ;;  %v2107_v30 = vpack.c.bf16 %v381_v25, %v380_v24  ;;  %v365_v32 = vld [vmem:[#allocation5 + $0x868] sm:$0xff]  ;;  %v438_v24 = vld [vmem:[#allocation5 + $0xab0] sm:$0xff]  ;;  %v439_v25 = vld [vmem:[#allocation5 + $0xab8] sm:$0xff] }
  0xd1   :  { %2118 = vmatpush3.bf16.msra.mxu1 %v2117_v31  ;;  %1181 = vmatprep.mubr.f32.mxu1 %v91_v44  ;;  %v364_v31 = vld [vmem:[#allocation5 + $0x860] sm:$0xff]  ;;  %v367_v44 = vld [vmem:[#allocation5 + $0x878] sm:$0xff]  ;;  %v453_v23 = vld [vmem:[#allocation5 + $0xb28] sm:$0xff] }
  0xd2   :  { %2120 = vmatprep.subr.bf16.mxu1 %v2119_v36  ;;  %v382_v36 = vld [vmem:[#allocation5 + $0x8f0] sm:$0xff]  ;;  %v2109_v40 = vpack.c.bf16 %v365_v32, %v364_v31  ;;  %v423_v32 = vld [vmem:[#allocation5 + $0xa38] sm:$0xff] }
  0xd3   :  { %2090 = vmatpush3.bf16.msra.mxu0 %v2089_v43  ;;  %v2111_v42 = vpack.c.bf16 %v383_v37, %v382_v36  ;;  %v366_v43 = vld [vmem:[#allocation5 + $0x870] sm:$0xff]  ;;  %v440_v36 = vld [vmem:[#allocation5 + $0xac0] sm:$0xff]  ;;  %v441_v37 = vld [vmem:[#allocation5 + $0xac8] sm:$0xff] }
  0xd4   :  { %2092 = vmatprep.subr.bf16.mxu0 %v2091_v46  ;;  %v2143_v46 = vpack.c.bf16 %v415_v39, %v414_v38  ;;  %v2113_v52 = vpack.c.bf16 %v367_v44, %v366_v43  ;;  %v422_v31 = vld [vmem:[#allocation5 + $0xa30] sm:$0xff]  ;;  %v472_v38 = vld [vmem:[#allocation5 + $0xbc0] sm:$0xff]  ;;  %v473_v39 = vld [vmem:[#allocation5 + $0xbc8] sm:$0xff] }
  0xd5   :  { %2122 = vmatpush3.bf16.msra.mxu1 %v2121_v45  ;;  %v398_v45 = vld [vmem:[#allocation5 + $0x970] sm:$0xff]  ;;  %v424_v43 = vld [vmem:[#allocation5 + $0xa40] sm:$0xff]  ;;  %v425_v44 = vld [vmem:[#allocation5 + $0xa48] sm:$0xff] }
  0xd6   :  { %2124 = vmatprep.subr.bf16.mxu1 %v2123_v50  ;;  %v464_v50 = vld [vmem:[#allocation5 + $0xb80] sm:$0xff]  ;;  %v2145_v53 = vpack.c.bf16 %v399_v47, %v398_v45  ;;  %v457_v47 = vld [vmem:[#allocation5 + $0xb48] sm:$0xff] }
  0xd7   :  { %2094 = vmatpush3.bf16.msra.mxu0 %v2093_v56  ;;  %v417_v56 = vld [vmem:[#allocation5 + $0xa08] sm:$0xff]  ;;  %v456_v45 = vld [vmem:[#allocation5 + $0xb40] sm:$0xff] }
  0xd8   :  { %2096 = vmatprep.subr.bf16.mxu0 %v2095_v58  ;;  %v2179_v58 = vpack.c.bf16 %v465_v51, %v464_v50  ;;  %v2149_v1 = vpack.c.bf16 %v417_v56, %v416_v55  ;;  %v474_v50 = vld [vmem:[#allocation5 + $0xbd0] sm:$0xff]  ;;  %v475_v51 = vld [vmem:[#allocation5 + $0xbd8] sm:$0xff] }
  0xd9   :  { %2126 = vmatpush3.bf16.msra.mxu1 %v2125_v57  ;;  %v448_v57 = vld [vmem:[#allocation5 + $0xb00] sm:$0xff]  ;;  %v426_v55 = vld [vmem:[#allocation5 + $0xa50] sm:$0xff]  ;;  %v427_v56 = vld [vmem:[#allocation5 + $0xa58] sm:$0xff] }
  0xda   :  { %2128 = vmatprep.subr.bf16.mxu1 %v2127_v62  ;;  %v466_v62 = vld [vmem:[#allocation5 + $0xb90] sm:$0xff]  ;;  %v2181_v3 = vpack.c.bf16 %v449_v59, %v448_v57  ;;  %v459_v59 = vld [vmem:[#allocation5 + $0xb58] sm:$0xff] }
  0xdb   :  { %2098 = vmatpush3.bf16.msra.mxu0 %v2097_v4  ;;  %v2151_v4 = vpack.c.bf16 %v435_v61, %v434_v60  ;;  %v2183_v8 = vpack.c.bf16 %v467_v63, %v466_v62  ;;  %v458_v57 = vld [vmem:[#allocation5 + $0xb50] sm:$0xff]  ;;  %v444_v60 = vld [vmem:[#allocation5 + $0xae0] sm:$0xff]  ;;  %v445_v61 = vld [vmem:[#allocation5 + $0xae8] sm:$0xff] }
  0xdc   :  { %2100 = vmatprep.subr.bf16.mxu0 %v2099_v6  ;;  %v419_v6 = vld [vmem:[#allocation5 + $0xa18] sm:$0xff]  ;;  %v476_v62 = vld [vmem:[#allocation5 + $0xbe0] sm:$0xff]  ;;  %v477_v63 = vld [vmem:[#allocation5 + $0xbe8] sm:$0xff] }
  0xdd   :  { %2130 = vmatpush3.bf16.msra.mxu1 %v2129_v5  ;;  %v418_v5 = vld [vmem:[#allocation5 + $0xa10] sm:$0xff] }
  0xde   :  { %2132 = vmatprep.subr.bf16.mxu1 %v2131_v10  ;;  %v436_v10 = vld [vmem:[#allocation5 + $0xaa0] sm:$0xff]  ;;  %v2153_v15 = vpack.c.bf16 %v419_v6, %v418_v5  ;;  %v2203_v6 = vpack.c.bf16 %v477_v63, %v476_v62 }
  0xdf   :  { %2102 = vmatpush3.bf16.msra.mxu0 %v2101_v16  ;;  %v95_v16 = vld [vmem:[#allocation2 + $0xb8] sm:$0xff]  ;;  %v460_v5 = vld [vmem:[#allocation5 + $0xb60] sm:$0xff] }
  0xe0   :  { %2104 = vmatprep.subr.bf16.mxu0 %v2103_v18  ;;  %v2155_v18 = vpack.c.bf16 %v437_v11, %v436_v10  ;;  %v478_v10 = vld [vmem:[#allocation5 + $0xbf0] sm:$0xff]  ;;  %v479_v11 = vld [vmem:[#allocation5 + $0xbf8] sm:$0xff] }
  0xe1   :  { %2134 = vmatpush3.bf16.msra.mxu1 %v2133_v17  ;;  %v2185_v17 = vpack.c.bf16 %v451_v9, %v450_v7  ;;  %v461_v7 = vld [vmem:[#allocation5 + $0xb68] sm:$0xff]  ;;  %v447_v9 = vld [vmem:[#allocation5 + $0xaf8] sm:$0xff] }
  0xe2   :  { %2136 = vmatprep.subr.bf16.mxu1 %v2135_v22  ;;  %v2187_v22 = vpack.c.bf16 %v469_v13, %v468_v12  ;;  %v2205_v13 = vpack.c.bf16 %v461_v7, %v460_v5 }
  0xe3   :  { %2106 = vmatpush3.bf16.msra.mxu0 %v2105_v28  ;;  %v2157_v28 = vpack.c.bf16 %v421_v20, %v420_v19  ;;  %v463_v19 = vld [vmem:[#allocation5 + $0xb78] sm:$0xff] }
  0xe4   :  { %2108 = vmatprep.subr.bf16.mxu0 %v2107_v30  ;;  %v2159_v30 = vpack.c.bf16 %v439_v25, %v438_v24  ;;  %v1406_v25 = vld [vmem:[#allocation7] ss:$0 sm:$0xff] }
  0xe5   :  { %2138 = vmatpush3.bf16.msra.mxu1 %v2137_v29  ;;  %v2189_v29 = vpack.c.bf16 %v453_v23, %v452_v21  ;;  %v94_v23 = vld [vmem:[#allocation2 + $0xb0] sm:$0xff] }
  0xe6   :  { %2140 = vmatprep.subr.bf16.mxu1 %v2139_v34  ;;  %v2191_v34 = vpack.c.bf16 %v471_v27, %v470_v26 }
  0xe7   :  { %2110 = vmatpush3.bf16.msra.mxu0 %v2109_v40  ;;  %v2161_v40 = vpack.c.bf16 %v423_v32, %v422_v31 }
  0xe8   :  { %2112 = vmatprep.subr.bf16.mxu0 %v2111_v42  ;;  %v2163_v42 = vpack.c.bf16 %v441_v37, %v440_v36 }
  0xe9   :  { %2142 = vmatpush3.bf16.msra.mxu1 %v2141_v41  ;;  %v2193_v41 = vpack.c.bf16 %v455_v35, %v454_v33 }
  0xea   :  { %2144 = vmatprep.subr.bf16.mxu1 %v2143_v46  ;;  %v2195_v46 = vpack.c.bf16 %v473_v39, %v472_v38 }
  0xeb   :  { %2114 = vmatpush3.bf16.msra.mxu0 %v2113_v52  ;;  %v2165_v52 = vpack.c.bf16 %v425_v44, %v424_v43 }
  0xec   :  { %2148 = vmatprep.subr.bf16.mxu0 %v2147_v54  ;;  %v2167_v54 = vpack.c.bf16 %v443_v49, %v442_v48 }
  0xed   :  { %2146 = vmatpush3.bf16.msra.mxu1 %v2145_v53  ;;  %v2197_v53 = vpack.c.bf16 %v457_v47, %v456_v45 }
  0xee   :  { %2180 = vmatprep.subr.bf16.mxu1 %v2179_v58  ;;  %1112 = vmatmul.mubr.f32.vlgmr.msra.gmra.mrb[8].mxu0 %v88_v0  ;;  %v2199_v58 = vpack.c.bf16 %v475_v51, %v474_v50  ;;  %v2169_v0 = vpack.c.bf16 %v427_v56, %v426_v55 }
  0xef   :  { %2150 = vmatpush3.bf16.msra.mxu0 %v2149_v1  ;;  %1251 = vmatprep.mubr.f32.mxu0 %v93_v14  ;;  %v2201_v1 = vpack.c.bf16 %v459_v59, %v458_v57 }
  0xf0   :  { %1182 = vmatmul.mubr.f32.vlgmr.msra.gmra.mrb[8].mxu1 %v90_v2  ;;  %2152 = vmatprep.subr.bf16.mxu0 %v2151_v4  ;;  %v2171_v2 = vpack.c.bf16 %v445_v61, %v444_v60  ;;  %v429_v4 = vld [vmem:[#allocation5 + $0xa68] sm:$0xff] }
  0xf1   :  { %2182 = vmatpush3.bf16.msra.mxu1 %v2181_v3  ;;  %1321 = vmatprep.mubr.f32.mxu1 %v95_v16  ;;  %v428_v3 = vld [vmem:[#allocation5 + $0xa60] sm:$0xff]  ;;  %v431_v16 = vld [vmem:[#allocation5 + $0xa78] sm:$0xff] }
  0xf2   :  { %2184 = vmatprep.subr.bf16.mxu1 %v2183_v8  ;;  %v446_v8 = vld [vmem:[#allocation5 + $0xaf0] sm:$0xff]  ;;  %v2173_v12 = vpack.c.bf16 %v429_v4, %v428_v3 }
  0xf3   :  { %2154 = vmatpush3.bf16.msra.mxu0 %v2153_v15  ;;  %v2175_v14 = vpack.c.bf16 %v447_v9, %v446_v8  ;;  %v430_v15 = vld [vmem:[#allocation5 + $0xa70] sm:$0xff] }
  0xf4   :  { %2156 = vmatprep.subr.bf16.mxu0 %v2155_v18  ;;  %v462_v18 = vld [vmem:[#allocation5 + $0xb70] sm:$0xff]  ;;  %v2177_v20 = vpack.c.bf16 %v431_v16, %v430_v15 }
  0xf5   :  { %2186 = vmatpush3.bf16.msra.mxu1 %v2185_v17  ;;  %v2207_v17 = vpack.c.bf16 %v479_v11, %v478_v10  ;;  %v2209_v21 = vpack.c.bf16 %v463_v19, %v462_v18  ;;  %v2377_v18 = vmov 2   ;;  %v2378_v19 = vmov 0  }
  0xf6   :  { %2188 = vmatprep.subr.bf16.mxu1 %v2187_v22  ;;  %v92_v22 = vld [vmem:[#allocation2 + $0xa0] sm:$0xff]  ;;  %2224 = vset.pattern.permute.xlu0 %v2377_v18 }
  0xf7   :  { %2158 = vmatpush3.bf16.msra.mxu0 %v2157_v28  ;;  %2222 = vset.pattern.permute.xlu1 %v2378_v19 }
  0xf8   :  { %2160 = vmatprep.subr.bf16.mxu0 %v2159_v30 }
  0xf9   :  { %2190 = vmatpush3.bf16.msra.mxu1 %v2189_v29 }
  0xfa   :  { %2192 = vmatprep.subr.bf16.mxu1 %v2191_v34 }
  0xfb   :  { %2162 = vmatpush3.bf16.msra.mxu0 %v2161_v40 }
  0xfc   :  { %2164 = vmatprep.subr.bf16.mxu0 %v2163_v42 }
  0xfd   :  { %2194 = vmatpush3.bf16.msra.mxu1 %v2193_v41 }
  0xfe   :  { %2196 = vmatprep.subr.bf16.mxu1 %v2195_v46 }
  0xff   :  { %2166 = vmatpush3.bf16.msra.mxu0 %v2165_v52 }
 0x100   :  { %2168 = vmatprep.subr.bf16.mxu0 %v2167_v54 }
 0x101   :  { %2198 = vmatpush3.bf16.msra.mxu1 %v2197_v53 }
 0x102   :  { %2200 = vmatprep.subr.bf16.mxu1 %v2199_v58 }
 0x103   :  { %2170 = vmatpush3.bf16.msra.mxu0 %v2169_v0 }
 0x104   :  { %2172 = vmatprep.subr.bf16.mxu0 %v2171_v2 }
 0x105   :  { %2202 = vmatpush3.bf16.msra.mxu1 %v2201_v1  ;;  %v1327_v1 = vlaneseq }
 0x106   :  { %2204 = vmatprep.subr.bf16.mxu1 %v2203_v6 }
 0x107   :  { %2174 = vmatpush3.bf16.msra.mxu0 %v2173_v12  ;;  %v1328_v8 = vand.u32 127, %v1327_v1 }
 0x108   :  { %2176 = vmatprep.subr.bf16.mxu0 %v2175_v14 }
 0x109   :  { %2206 = vmatpush3.bf16.msra.mxu1 %v2205_v13  ;;  %vm1329_vm0 = vcmp.lt.s32.totalorder %v1328_v8, 3 }
 0x10a   :  { %2208 = vmatprep.subr.bf16.mxu1 %v2207_v17 }
 0x10b   :  { %2178 = vmatpush3.bf16.msra.mxu0 %v2177_v20 }
 0x10d   :  { %2210 = vmatpush3.bf16.msra.mxu1 %v2209_v21  ;;  %v1367_v21 = vshrl.u32 %v1327_v1, 7 }
 0x10e   :  { %1252 = vmatmul.mubr.f32.vlgmr.msra.gmra.mrb[10].mxu0 %v92_v22 }
 0x10f   :  { %vm1371_vm1 = vcmp.lt.s32.totalorder %v1367_v21, 2 }
 0x110   :  { %1322 = vmatmul.mubr.f32.vlgmr.msra.gmra.mrb[10].mxu1 %v94_v23 }
 0x141   :  { %v1439_v24 = vpop.f32.mrb[0].mxu0 }
 0x142   :  { %v1440_v26 = vpop.f32.mrb[1].mxu0 }
 0x143   :  { %v1474_v27 = vpop.f32.mrb[0].mxu1  ;;  %v1441_v28 = vadd.f32 %v1440_v26, %v1439_v24 }
 0x144   :  { %v1475_v29 = vpop.f32.mrb[1].mxu1 }
 0x145   :  { %v1476_v30 = vadd.f32 %v1475_v29, %v1474_v27  ;;  %v554_v31 = vadd.f32 %v1441_v28, %v1406_v25  ;;  %v2379_v25 = vmov 1  }
 0x147   :  { %v624_v32 = vadd.f32 %v1476_v30, %v554_v31 }
 0x161   :  { %v1509_v33 = vpop.f32.mrb[2].mxu0 }
 0x162   :  { %v1510_v34 = vpop.f32.mrb[3].mxu0 }
 0x163   :  { %v1544_v35 = vpop.f32.mrb[2].mxu1  ;;  %v1511_v36 = vadd.f32 %v1510_v34, %v1509_v33 }
 0x164   :  { %v1545_v37 = vpop.f32.mrb[3].mxu1 }
 0x165   :  { %v1546_v38 = vadd.f32 %v1545_v37, %v1544_v35  ;;  %v694_v39 = vadd.f32 %v1511_v36, %v624_v32 }
 0x167   :  { %v764_v40 = vadd.f32 %v1546_v38, %v694_v39 }
 0x181   :  { %v1579_v41 = vpop.f32.mrb[4].mxu0 }
 0x182   :  { %v1580_v42 = vpop.f32.mrb[5].mxu0 }
 0x183   :  { %v1614_v43 = vpop.f32.mrb[4].mxu1  ;;  %v1581_v44 = vadd.f32 %v1580_v42, %v1579_v41 }
 0x184   :  { %v1615_v45 = vpop.f32.mrb[5].mxu1 }
 0x185   :  { %v1616_v46 = vadd.f32 %v1615_v45, %v1614_v43  ;;  %v834_v47 = vadd.f32 %v1581_v44, %v764_v40 }
 0x187   :  { %v904_v48 = vadd.f32 %v1616_v46, %v834_v47 }
 0x1a1   :  { %v1649_v49 = vpop.f32.mrb[6].mxu0 }
 0x1a2   :  { %v1650_v50 = vpop.f32.mrb[7].mxu0 }
 0x1a3   :  { %v1684_v51 = vpop.f32.mrb[6].mxu1  ;;  %v1651_v52 = vadd.f32 %v1650_v50, %v1649_v49 }
 0x1a4   :  { %v1685_v53 = vpop.f32.mrb[7].mxu1 }
 0x1a5   :  { %v1686_v54 = vadd.f32 %v1685_v53, %v1684_v51  ;;  %v974_v55 = vadd.f32 %v1651_v52, %v904_v48 }
 0x1a7   :  { %v1044_v56 = vadd.f32 %v1686_v54, %v974_v55 }
 0x1c1   :  { %v1719_v57 = vpop.f32.mrb[8].mxu0 }
 0x1c2   :  { %v1720_v58 = vpop.f32.mrb[9].mxu0 }
 0x1c3   :  { %v1754_v59 = vpop.f32.mrb[8].mxu1  ;;  %v1721_v60 = vadd.f32 %v1720_v58, %v1719_v57 }
 0x1c4   :  { %v1755_v61 = vpop.f32.mrb[9].mxu1 }
 0x1c5   :  { %v1756_v62 = vadd.f32 %v1755_v61, %v1754_v59  ;;  %v1114_v63 = vadd.f32 %v1721_v60, %v1044_v56 }
 0x1c7   :  { %v1184_v0 = vadd.f32 %v1756_v62, %v1114_v63 }
 0x1e1   :  { %v1789_v2 = vpop.f32.mrb[10].mxu0 }
 0x1e2   :  { %v1790_v3 = vpop.f32.mrb[11].mxu0 }
 0x1e3   :  { %v1824_v4 = vpop.f32.mrb[10].mxu1  ;;  %v1791_v5 = vadd.f32 %v1790_v3, %v1789_v2 }
 0x1e4   :  { %v1825_v6 = vpop.f32.mrb[11].mxu1 }
 0x1e5   :  { %v1826_v7 = vadd.f32 %v1825_v6, %v1824_v4  ;;  %v1254_v9 = vadd.f32 %v1791_v5, %v1184_v0 }
 0x1e7   :  { %v1324_v10 = vadd.f32 %v1826_v7, %v1254_v9 }
 0x1e9   :  { %v1330_v11 = vmax.f32 %v1324_v10, 0.0 }
 0x1eb   :  { %v1331_v12 = vsel %vm1329_vm0, %v1330_v11, -1e+30 }
 0x1ec   :  { %1332 = vmax.xlane.f32.xlu0 %v1331_v12 }
 0x279   :  { %v1333_v13 = vpop.xlane.xlu0 %1332 }
 0x27a   :  { %v1334_v14 = vsub.f32 %v1331_v12, %v1333_v13 }
 0x27c   :  { %v1335_v15 = vmul.f32 1.442695, %v1334_v14 }
 0x27e   :  { %2225 = vpow2.f32 %v1335_v15 }
 0x288   :  { %v2226_v16 = vpop.eup %2225 }
 0x289   :  { %v1337_v17 = vsel %vm1329_vm0, %v2226_v16, 0.0 }
 0x28a   :  { %1338 = vadd.xlane.f32.xlu0 %v1337_v17 }
 0x317   :  { %v1339_v20 = vpop.xlane.xlu0 %1338 }
 0x318   :  { %2227 = vrcp.f32 %v1339_v20 }
 0x322   :  { %v2228_v22 = vpop.eup %2227 }
 0x323   :  { %v1341_v23 = vmul.f32 %v2228_v22, %v1337_v17 }
 0x325   :  { %1360 = vperm.xlu0 %2224, %v1341_v23   ;;  %1345 = vperm.xlu1 %2222, %v1341_v23   ;;  %v1372_v24 = vsel %vm1371_vm1, %v1341_v23, 0.0 }
 0x326   :  { %1374 = vst [vmem:[#allocation11] sm:$0xff] %v1372_v24 }
 0x329   :  { %2223 = vset.pattern.permute.xlu1 %v2379_v25 }
 0x32a   :  { %1352 = vperm.xlu1 %2223, %v1341_v23  }
 0x32b   :  { %2328 = shalt.err (!%p2325_p8)
}
 0x32c   :  { %s2329_s19 = scalar_lea.hbm %s2495_s5, 128 }
 0x32d   :  { %p2330_p9 = scmp.ne.s32.totalorder %s2495_s5, %s2329_s19  ;;  %p2333_p10 = scmp.lt.u32.totalorder %s2329_s19, %s2495_s5 }
 0x32f   :  { %p2335_p11 = pnand %p2333_p10, %p2330_p9 }
 0x331   :  { %2338 = shalt.err (!%p2335_p11)
}
 0x332   :  { %1394 = dma.vmem_to_hbm [thread:$0]  %s1392_s28, 128, %s2495_s5, [#allocation12]   ;;  %v1342_v27 = vld [vmem:[#allocation8] sm:$0xff]  ;;  %v1350_v28 = vld [vmem:[#allocation8 + $0x8] sm:$0xff]  ;;  %v1358_v29 = vld [vmem:[#allocation8 + $0x10] sm:$0xff] }
 0x333   :  { %s2381_s26 = smov [#allocation10]  }
 0x334   :  { %s1381_s27 = sshll.u32 %s2381_s26, 4  ;;  %s1382_s27 = int_to_ptr.vmem [resolvable:$true] %s1381_s27 }
 0x335   :  { %s2339_s30 = scalar_lea.vmem %s1382_s27, 128  ;;  %p2344_p13 = scmp.lt.s32.totalorder %s1382_s27, %s1382_s27 }
 0x336   :  { %p2340_p12 = scmp.ne.s32.totalorder %s1382_s27, %s2339_s30  ;;  %p2345_p0 = scmp.lt.s32.totalorder %s2339_s30, %s2339_s30 }
 0x338   :  { %p2346_p1 = por %p2345_p0, %p2344_p13 }
 0x33a   :  { %p2347_p2 = pnand %p2346_p1, %p2340_p12 }
 0x3a4   :  { %v1346_v26 = vpop.permute.xlu1 %1345  ;;  %v1361_v30 = vpop.permute.xlu0 %1360 }
 0x3a5   :  { %v1348_v32 = vmul.f32 %v1346_v26, %v1342_v27  ;;  %v1363_v34 = vmul.f32 %v1361_v30, %v1358_v29 }
 0x3a9   :  { %v1353_v31 = vpop.permute.xlu1 %1352 }
 0x3aa   :  { %v1355_v33 = vmul.f32 %v1353_v31, %v1350_v28 }
 0x3ac   :  { %v1356_v35 = vadd.f32 %v1355_v33, %v1348_v32 }
 0x3ae   :  { %v1364_v36 = vadd.f32 %v1363_v34, %v1356_v35 }
 0x3b0   :  { %1365 = vst [vmem:[#allocation10] sm:$0xff] %v1364_v36 }
 0x3b1   :  { %2350 = shalt.err (!%p2347_p2)
}
 0x3b2   :  { %s2351_s6 = scalar_lea.hbm %s2494_s4, 128 }
 0x3b3   :  { %p2352_p3 = scmp.ne.s32.totalorder %s2494_s4, %s2351_s6  ;;  %p2355_p4 = scmp.lt.u32.totalorder %s2351_s6, %s2494_s4 }
 0x3b5   :  { %p2357_p5 = pnand %p2355_p4, %p2352_p3 }
 0x3b7   :  { %2360 = shalt.err (!%p2357_p5)
}
 0x3b8   :  { %1384 = dma.vmem_to_hbm [thread:$0]  %s1382_s27, 128, %s2494_s4, [#allocation4]  }
 0x3b9   :  { %2367 = dma.done.wait [#allocation4], 128  }
 0x3ba   :  { %2368 = vsyncadd [#allocation4], 4294967168 }
 0x3bb   :  { %2369 = dma.done.wait [#allocation12], 128  }
 0x3bc   :  { %2370 = vsyncadd [#allocation12], 4294967168 }
 0x3bd   :  { %1401 = vsyncpa [#allocation3], 1 }
 0x3be   :  { %1402 = vsyncpa [#allocation6], 1 }
 0x3bf   :  { %1403 = vsyncpa [#allocation9], 1 }
 0x3c0   :  { %1404 = vsyncpa [#allocation4], 1 }
 0x3c1   :  { %1405 = vsyncpa [#allocation12], 1 }

</bundles_post_ra>
